<compile_context>
chip_gen: v7x
topology: tpu7x:2x2x1
jax: 0.10.0
libtpu: 0.0.40
codegen_flags: <defaults>
</compile_context>

<pallas_src>
import functools

import numpy as np
import jax
import jax.numpy as jnp
from jax.experimental import pallas as pl
from jax.experimental.pallas import tpu as pltpu

LANE = 128


def _round_up(n, m):
    return ((n + m - 1) // m) * m


def _so2_block_kernel(x_ref, edge_ref, *refs, seg_widths, H):
    """refs = (wd_all, bd_all, w1_0, w2_0, [w1cat_m, w2real_m, w2imag_m]*mmax, out_ref).

    x_ref   : (eb, W)  m-ordered coefficients; each per-m block padded to 128 lanes
    edge_ref: (eb, EC)
    out_ref : (eb, W)
    """
    out_ref = refs[-1]
    w = refs[:-1]
    wd, bd, w10, w20 = w[0], w[1], w[2], w[3]
    f32 = jnp.float32

    # ---- single fused gate matmul for fc1_dist0 and every per-m fc1_dist ----
    e = edge_ref[...]
    g_all = jax.nn.silu(
        jnp.dot(e, wd[...], preferred_element_type=f32) + bd[...].astype(f32))

    # ---------------- m = 0 ----------------
    d0p = seg_widths[0]
    x0 = x_ref[:, :d0p]
    h0 = jnp.dot(x0, w10[...], preferred_element_type=f32) * g_all[:, :H]
    out_ref[:, :d0p] = jnp.dot(
        h0.astype(w20.dtype), w20[...],
        preferred_element_type=f32).astype(out_ref.dtype)

    # ---------------- m >= 1 (SO2Conv) ----------------
    col = d0p
    gcol = H
    for i in range(len(seg_widths) - 1):
        dmp = seg_widths[i + 1]
        w1cat = w[4 + 3 * i]     # (dmp, 2H) = [fc1_r | fc1_i]
        w2real = w[5 + 3 * i]    # (2H, dmp) = [w2r ; -w2i]
        w2imag = w[6 + 3 * i]    # (2H, dmp) = [w2r ;  w2i]

        gd = g_all[:, gcol:gcol + 2 * H]                      # (eb, 2H) = [g_r | g_i]

        xr = x_ref[:, col:col + dmp]                          # real coefficient block
        xi = x_ref[:, col + dmp:col + 2 * dmp]                # imag coefficient block

        hr = jnp.dot(xr, w1cat[...], preferred_element_type=f32) * gd
        hi = jnp.dot(xi, w1cat[...], preferred_element_type=f32) * gd
        # hr = [ (xr@W1r)*g_r | (xr@W1i)*g_i ],  hi likewise for xi.

        p_real = jnp.concatenate([hr[:, :H], hi[:, H:]], axis=1)   # [p_rr | p_ii]
        p_imag = jnp.concatenate([hi[:, :H], hr[:, H:]], axis=1)   # [p_ri | p_ir]

        out_ref[:, col:col + dmp] = jnp.dot(
            p_real.astype(w2real.dtype), w2real[...],
            preferred_element_type=f32).astype(out_ref.dtype)
        out_ref[:, col + dmp:col + 2 * dmp] = jnp.dot(
            p_imag.astype(w2imag.dtype), w2imag[...],
            preferred_element_type=f32).astype(out_ref.dtype)

        col += 2 * dmp
        gcol += 2 * H


def so2_block_forward(x, x_edge, params, to_m, m_size, *, edge_block=128,
                      stream_dtype=None, vmem_limit_bytes=64 * 1024 * 1024):
    """x: (E, K, C), x_edge: (E, EC) -> (E, K, C)."""
    E, K, C = x.shape
    EC = x_edge.shape[1]
    H = params["w1_0"].shape[1]
    mmax = len(m_size) - 1
    # TODO(synk): real eSCN configs with mmax < lmax have a reduced m-order
    # coefficient count != K; this harness assumes mmax == lmax (square to_m).
    assert m_size[0] + 2 * sum(m_size[1:]) == K

    dt = x.dtype if stream_dtype is None else jnp.dtype(stream_dtype)

    # --- permutation (0/1) matrix -> static index gathers, no dense matmul ----
    to_m_np = np.asarray(jax.device_get(to_m))
    order = np.argmax(to_m_np, axis=1).astype(np.int32)        # m-row -> l-col
    inv_order = np.argsort(order).astype(np.int32)             # l-col -> m-row
    x_m = jnp.take(x, jnp.asarray(order), axis=1)              # (E, K, C) m-ordered

    # --- lane-dense slab: every per-m block zero-padded to a 128-lane multiple ---
    d0 = m_size[0] * C
    d0p = _round_up(d0, LANE)
    seg_widths = [d0p]
    pieces = [jnp.pad(x_m[:, :m_size[0], :].reshape(E, d0), ((0, 0), (0, d0p - d0)))]
    off = m_size[0]
    for m in range(1, mmax + 1):
        sm = m_size[m]
        dm = sm * C
        dmp = _round_up(dm, LANE)
        seg_widths.append(dmp)
        xr = x_m[:, off:off + sm, :].reshape(E, dm)
        xi = x_m[:, off + sm:off + 2 * sm, :].reshape(E, dm)
        pieces.append(jnp.pad(xr, ((0, 0), (0, dmp - dm))))
        pieces.append(jnp.pad(xi, ((0, 0), (0, dmp - dm))))
        off += 2 * sm
    x_flat = jnp.concatenate(pieces, axis=1).astype(dt)
    W = x_flat.shape[1]

    # --- pad edge dim so the grid has no remainder tile ------------------------
    eb = edge_block
    assert eb % 8 == 0
    E_pad = _round_up(E, eb)
    if E_pad != E:
        x_flat = jnp.pad(x_flat, ((0, E_pad - E), (0, 0)))
        x_edge_p = jnp.pad(x_edge, ((0, E_pad - E), (0, 0)))
    else:
        x_edge_p = x_edge
    x_edge_p = x_edge_p.astype(dt)

    # --- weight packing (pre-transposed so y = x @ W + b), zero-padded to the
    #     same lane-dense widths as the x slab ---------------------------------
    def padr(wm, rows): return jnp.pad(wm, ((0, rows - wm.shape[0]), (0, 0)))
    def padc(wm, cols): return jnp.pad(wm, ((0, 0), (0, cols - wm.shape[1])))

    wd_list = [params["wd0"]]
    bd_list = [params["bd0"].reshape(1, -1)]
    per_m_w = []
    for i, (wdm, bdm, w1r, w2r, w1i, w2i) in enumerate(params["per_m"]):
        dmp = seg_widths[i + 1]
        wd_list.append(wdm)
        bd_list.append(bdm.reshape(1, -1))
        per_m_w += [padr(jnp.concatenate([w1r, w1i], axis=1), dmp),    # (dmp, 2H)
                    padc(jnp.concatenate([w2r, -w2i], axis=0), dmp),   # (2H, dmp)
                    padc(jnp.concatenate([w2r, w2i], axis=0), dmp)]    # (2H, dmp)
    weights = [jnp.concatenate(wd_list, axis=1),        # (EC, H + 2H*mmax)  fused gate
               jnp.concatenate(bd_list, axis=1),        # (1,  H + 2H*mmax)
               padr(params["w1_0"], d0p),               # (d0p, H)
               padc(params["w2_0"], d0p)] + per_m_w     # (H, d0p)
    weights = [wa.astype(dt) for wa in weights]

    kernel = functools.partial(_so2_block_kernel,
                               seg_widths=tuple(seg_widths), H=H)
    w_specs = [pl.BlockSpec(wa.shape, lambda i: (0, 0)) for wa in weights]

    # advisory cost estimate so XLA schedules the surrounding gathers well
    bpe = jnp.dtype(dt).itemsize
    Gtot = int(weights[0].shape[1])
    flops = int(E_pad) * int(2 * EC * Gtot + 4 * d0p * H
                             + sum(16 * wdt * H for wdt in seg_widths[1:]))
    bytes_accessed = int((2 * E_pad * W + E_pad * EC) * bpe
                         + sum(int(np.prod(wa.shape)) for wa in weights) * bpe)
    cost = pl.CostEstimate(flops=flops, transcendentals=int(E_pad * Gtot),
                           bytes_accessed=bytes_accessed)

    z_flat = pl.pallas_call(
        kernel,
        out_shape=jax.ShapeDtypeStruct((E_pad, W), dt),
        grid=(E_pad // eb,),
        in_specs=[pl.BlockSpec((eb, W), lambda i: (i, 0)),    # x slab (streams)
                  pl.BlockSpec((eb, EC), lambda i: (i, 0))]   # edge embedding (streams)
                 + w_specs,                                   # weights (grid-constant)
        out_specs=pl.BlockSpec((eb, W), lambda i: (i, 0)),
        compiler_params=pltpu.CompilerParams(
            dimension_semantics=("parallel",),
            vmem_limit_bytes=vmem_limit_bytes),
        cost_estimate=cost,
    )(x_flat, x_edge_p, *weights)

    # --- unpack: drop padding rows/cols, restore l-major coefficient order -----
    outs = [z_flat[:E, :d0].reshape(E, m_size[0], C)]
    col = d0p
    for m in range(1, mmax + 1):
        sm = m_size[m]
        dm = sm * C
        dmp = seg_widths[m]
        outs.append(z_flat[:E, col:col + dm].reshape(E, sm, C))
        outs.append(z_flat[:E, col + dmp:col + dmp + dm].reshape(E, sm, C))
        col += 2 * dmp
    z_m = jnp.concatenate(outs, axis=1)                       # (E, K, C) m-ordered
    return jnp.take(z_m, jnp.asarray(inv_order), axis=1).astype(x.dtype)


# ---------------------------------------------------------------------------
# Test harness: parameter init, CoefficientMapping (to_m), pure-JAX reference.
# ---------------------------------------------------------------------------

def build_to_m(lmax, mmax):
    """Permutation matrix mapping l-major coefficient order to m-grouped order."""
    assert mmax == lmax  # square mapping for this self-contained test
    K = (lmax + 1) ** 2

    def lm_idx(l, m):
        return l * l + l + m

    order = []
    for m in range(mmax + 1):
        order += [lm_idx(l, m) for l in range(m, lmax + 1)]
        if m > 0:
            order += [lm_idx(l, -m) for l in range(m, lmax + 1)]
    to_m = np.zeros((K, K), dtype=np.float32)
    for row, col in enumerate(order):
        to_m[row, col] = 1.0
    m_size = [lmax + 1] + [lmax - m + 1 for m in range(1, mmax + 1)]
    return jnp.asarray(to_m), m_size


def init_params(key, lmax, mmax, C, H, EC):
    """nn.Linear-style uniform init; weights stored pre-transposed (in, out)."""
    keys = iter(jax.random.split(key, 4 + 6 * mmax))

    def u(shape, fan_in):
        b = 1.0 / np.sqrt(fan_in)
        return jax.random.uniform(next(keys), shape, jnp.float32, -b, b)

    d0 = (lmax + 1) * C
    params = {
        "wd0": u((EC, H), EC), "bd0": u((H,), EC),           # fc1_dist0
        "w1_0": u((d0, H), d0), "w2_0": u((H, d0), H),       # fc1_m0 / fc2_m0 (no bias)
        "per_m": [],
    }
    for m in range(1, mmax + 1):
        dm = (lmax - m + 1) * C
        params["per_m"].append((
            u((EC, 2 * H), EC), u((2 * H,), EC),             # fc1_dist
            u((dm, H), dm), u((H, dm), H),                   # fc1_r / fc2_r
            u((dm, H), dm), u((H, dm), H),                   # fc1_i / fc2_i
        ))
    return params


def so2_block_reference(x, x_edge, params, to_m, m_size):
    """Direct JAX transcription of the PyTorch SO2Block.forward."""
    E, K, C = x.shape
    x = jnp.einsum('nac,ba->nbc', x, to_m)

    g0 = jax.nn.silu(x_edge @ params["wd0"] + params["bd0"])
    s0 = m_size[0]
    x0 = x[:, :s0].reshape(E, -1)
    x0 = ((x0 @ params["w1_0"]) * g0) @ params["w2_0"]
    x = x.at[:, :s0].set(x0.reshape(E, s0, C))

    offset = s0
    for m in range(1, len(m_size)):
        sm = m_size[m]
        wd, bd, w1r, w2r, w1i, w2i = params["per_m"][m - 1]
        xm = x[:, offset:offset + 2 * sm].reshape(E, 2, sm * C)
        ge = jax.nn.silu(x_edge @ wd + bd).reshape(E, 2, -1)
        xr = ((xm @ w1r) * ge[:, 0:1, :]) @ w2r
        xi = ((xm @ w1i) * ge[:, 1:2, :]) @ w2i
        x_m_r = xr[:, 0] - xi[:, 1]
        x_m_i = xr[:, 1] + xi[:, 0]
        xm_out = jnp.stack([x_m_r, x_m_i], axis=1).reshape(E, 2 * sm, C)
        x = x.at[:, offset:offset + 2 * sm].set(xm_out)
        offset += 2 * sm

    return jnp.einsum('nac,ab->nbc', x, to_m)


if __name__ == "__main__":
    lmax = mmax = 2
    sphere_channels = 8
    hidden_channels = 16
    edge_channels = 16
    num_edges = 200                      # not a multiple of the tile -> exercises padding

    key = jax.random.PRNGKey(0)
    kx, ke, kp = jax.random.split(key, 3)

    to_m, m_size = build_to_m(lmax, mmax)
    K = (lmax + 1) ** 2

    x = jax.random.normal(kx, (num_edges, K, sphere_channels), jnp.float32)
    x_edge = jax.random.normal(ke, (num_edges, edge_channels), jnp.float32)
    params = init_params(kp, lmax, mmax, sphere_channels, hidden_channels, edge_channels)

    ref = so2_block_reference(x, x_edge, params, to_m, m_size)

    # f32 streaming path (matches reference to tight tolerance).
    # eb=64 -> E_pad=256 -> 4 grid steps (even: balances v7x's 2 TensorCores).
    out = so2_block_forward(x, x_edge, params, to_m, m_size, edge_block=64)
    out = jax.block_until_ready(out)
    assert out.shape == (num_edges, K, sphere_channels)
    err = jnp.max(jnp.abs(out - ref))
    assert jnp.allclose(out, ref, atol=1e-4, rtol=1e-4), f"max err {err}"

    # bf16 streaming path (v6e/v7x): bf16 MXU operands, f32 accumulation/gating.
    out_bf = so2_block_forward(x, x_edge, params, to_m, m_size, edge_block=64,
                               stream_dtype=jnp.bfloat16)
    out_bf = jax.block_until_ready(out_bf)
    err_bf = jnp.max(jnp.abs(out_bf.astype(jnp.float32) - ref))
    assert jnp.allclose(out_bf.astype(jnp.float32), ref, atol=1e-1, rtol=1e-1), \
        f"bf16 max err {err_bf}"

    print("KERNEL_OK")
</pallas_src>

<mosaic_0001>
module attributes {stable_mosaic.version = 11 : i64} {
  func.func @_so2_block_kernel(%arg0: i32, %arg1: memref<64x640xf32, #tpu.memory_space<vmem>>, %arg2: memref<64x16xf32, #tpu.memory_space<vmem>>, %arg3: memref<16x80xf32, #tpu.memory_space<vmem>>, %arg4: memref<1x80xf32, #tpu.memory_space<vmem>>, %arg5: memref<128x16xf32, #tpu.memory_space<vmem>>, %arg6: memref<16x128xf32, #tpu.memory_space<vmem>>, %arg7: memref<128x32xf32, #tpu.memory_space<vmem>>, %arg8: memref<32x128xf32, #tpu.memory_space<vmem>>, %arg9: memref<32x128xf32, #tpu.memory_space<vmem>>, %arg10: memref<128x32xf32, #tpu.memory_space<vmem>>, %arg11: memref<32x128xf32, #tpu.memory_space<vmem>>, %arg12: memref<32x128xf32, #tpu.memory_space<vmem>>, %arg13: memref<64x640xf32, #tpu.memory_space<vmem>>) attributes {dimension_semantics = [#tpu.dimension_semantics<parallel>], iteration_bounds = array<i64: 4>, scalar_prefetch = 0 : i64, scratch_operands = 0 : i64, tpu.core_type = #tpu.core_type<tc>, window_params = [{transform_indices = @transform_0, window_bounds = array<i64: 64, 640>}, {transform_indices = @transform_1, window_bounds = array<i64: 64, 16>}, {pipeline_mode = #tpu.pipeline_mode<synchronous>, transform_indices = @transform_2, window_bounds = array<i64: 16, 80>}, {pipeline_mode = #tpu.pipeline_mode<synchronous>, transform_indices = @transform_3, window_bounds = array<i64: 1, 80>}, {pipeline_mode = #tpu.pipeline_mode<synchronous>, transform_indices = @transform_4, window_bounds = array<i64: 128, 16>}, {pipeline_mode = #tpu.pipeline_mode<synchronous>, transform_indices = @transform_5, window_bounds = array<i64: 16, 128>}, {pipeline_mode = #tpu.pipeline_mode<synchronous>, transform_indices = @transform_6, window_bounds = array<i64: 128, 32>}, {pipeline_mode = #tpu.pipeline_mode<synchronous>, transform_indices = @transform_7, window_bounds = array<i64: 32, 128>}, {pipeline_mode = #tpu.pipeline_mode<synchronous>, transform_indices = @transform_8, window_bounds = array<i64: 32, 128>}, {pipeline_mode = #tpu.pipeline_mode<synchronous>, transform_indices = @transform_9, window_bounds = array<i64: 128, 32>}, {pipeline_mode = #tpu.pipeline_mode<synchronous>, transform_indices = @transform_10, window_bounds = array<i64: 32, 128>}, {pipeline_mode = #tpu.pipeline_mode<synchronous>, transform_indices = @transform_11, window_bounds = array<i64: 32, 128>}, {transform_indices = @transform_12, window_bounds = array<i64: 64, 640>}]} {
    %c0 = arith.constant 0 : index
    %c0_0 = arith.constant 0 : index
    %0 = vector.load %arg2[%c0, %c0_0] : memref<64x16xf32, #tpu.memory_space<vmem>>, vector<64x16xf32>
    %c0_1 = arith.constant 0 : index
    %c0_2 = arith.constant 0 : index
    %1 = vector.load %arg3[%c0_1, %c0_2] : memref<16x80xf32, #tpu.memory_space<vmem>>, vector<16x80xf32>
    %cst = arith.constant dense<0.000000e+00> : vector<64x80xf32>
    %2 = tpu.matmul %0, %1, %cst {dimension_numbers = #tpu.dot_dimension_numbers<[1], [0], [0], [1], [0, 0, 1, 1], [], []>} : vector<64x16xf32>, vector<16x80xf32>, vector<64x80xf32> -> vector<64x80xf32>
    %c0_3 = arith.constant 0 : index
    %c0_4 = arith.constant 0 : index
    %3 = vector.load %arg4[%c0_3, %c0_4] : memref<1x80xf32, #tpu.memory_space<vmem>>, vector<1x80xf32>
    %4 = vector.broadcast %3 : vector<1x80xf32> to vector<64x80xf32>
    %5 = arith.addf %2, %4 : vector<64x80xf32>
    %6 = arith.negf %5 : vector<64x80xf32>
    %7 = math.exp %6 : vector<64x80xf32>
    %cst_5 = arith.constant 1.000000e+00 : f32
    %8 = vector.broadcast %cst_5 : f32 to vector<64x80xf32>
    %9 = arith.addf %8, %7 : vector<64x80xf32>
    %10 = arith.divf %8, %9 : vector<64x80xf32>
    %11 = arith.mulf %5, %10 : vector<64x80xf32>
    %c0_6 = arith.constant 0 : index
    %c0_7 = arith.constant 0 : index
    %12 = vector.load %arg1[%c0_6, %c0_7] : memref<64x640xf32, #tpu.memory_space<vmem>>, vector<64x128xf32>
    %c0_8 = arith.constant 0 : index
    %c0_9 = arith.constant 0 : index
    %13 = vector.load %arg5[%c0_8, %c0_9] : memref<128x16xf32, #tpu.memory_space<vmem>>, vector<128x16xf32>
    %cst_10 = arith.constant dense<0.000000e+00> : vector<64x16xf32>
    %14 = tpu.matmul %12, %13, %cst_10 {dimension_numbers = #tpu.dot_dimension_numbers<[1], [0], [0], [1], [0, 0, 1, 1], [], []>} : vector<64x128xf32>, vector<128x16xf32>, vector<64x16xf32> -> vector<64x16xf32>
    %15 = vector.extract_strided_slice %11 {offsets = [0, 0], sizes = [64, 16], strides = [1, 1]} : vector<64x80xf32> to vector<64x16xf32>
    %16 = arith.mulf %14, %15 : vector<64x16xf32>
    %c0_11 = arith.constant 0 : index
    %c0_12 = arith.constant 0 : index
    %17 = vector.load %arg6[%c0_11, %c0_12] : memref<16x128xf32, #tpu.memory_space<vmem>>, vector<16x128xf32>
    %cst_13 = arith.constant dense<0.000000e+00> : vector<64x128xf32>
    %18 = tpu.matmul %16, %17, %cst_13 {dimension_numbers = #tpu.dot_dimension_numbers<[1], [0], [0], [1], [0, 0, 1, 1], [], []>} : vector<64x16xf32>, vector<16x128xf32>, vector<64x128xf32> -> vector<64x128xf32>
    %c0_14 = arith.constant 0 : index
    %c0_15 = arith.constant 0 : index
    %19 = vector.load %arg13[%c0_14, %c0_15] : memref<64x640xf32, #tpu.memory_space<vmem>>, vector<64x128xf32>
    tpu.vector_store %arg13[%c0_14, %c0_15], %18 {strides = array<i32>} : memref<64x640xf32, #tpu.memory_space<vmem>>, vector<64x128xf32>,
    %20 = vector.extract_strided_slice %11 {offsets = [0, 16], sizes = [64, 32], strides = [1, 1]} : vector<64x80xf32> to vector<64x32xf32>
    %c0_16 = arith.constant 0 : index
    %c128 = arith.constant 128 : index
    %21 = vector.load %arg1[%c0_16, %c128] : memref<64x640xf32, #tpu.memory_space<vmem>>, vector<64x128xf32>
    %c0_17 = arith.constant 0 : index
    %c256 = arith.constant 256 : index
    %22 = vector.load %arg1[%c0_17, %c256] : memref<64x640xf32, #tpu.memory_space<vmem>>, vector<64x128xf32>
    %c0_18 = arith.constant 0 : index
    %c0_19 = arith.constant 0 : index
    %23 = vector.load %arg7[%c0_18, %c0_19] : memref<128x32xf32, #tpu.memory_space<vmem>>, vector<128x32xf32>
    %cst_20 = arith.constant dense<0.000000e+00> : vector<64x32xf32>
    %24 = tpu.matmul %21, %23, %cst_20 {dimension_numbers = #tpu.dot_dimension_numbers<[1], [0], [0], [1], [0, 0, 1, 1], [], []>} : vector<64x128xf32>, vector<128x32xf32>, vector<64x32xf32> -> vector<64x32xf32>
    %25 = arith.mulf %24, %20 : vector<64x32xf32>
    %c0_21 = arith.constant 0 : index
    %c0_22 = arith.constant 0 : index
    %26 = vector.load %arg7[%c0_21, %c0_22] : memref<128x32xf32, #tpu.memory_space<vmem>>, vector<128x32xf32>
    %cst_23 = arith.constant dense<0.000000e+00> : vector<64x32xf32>
    %27 = tpu.matmul %22, %26, %cst_23 {dimension_numbers = #tpu.dot_dimension_numbers<[1], [0], [0], [1], [0, 0, 1, 1], [], []>} : vector<64x128xf32>, vector<128x32xf32>, vector<64x32xf32> -> vector<64x32xf32>
    %28 = arith.mulf %27, %20 : vector<64x32xf32>
    %29 = vector.extract_strided_slice %25 {offsets = [0, 0], sizes = [64, 16], strides = [1, 1]} : vector<64x32xf32> to vector<64x16xf32>
    %30 = vector.extract_strided_slice %28 {offsets = [0, 16], sizes = [64, 16], strides = [1, 1]} : vector<64x32xf32> to vector<64x16xf32>
    %31 = tpu.concatenate %29, %30 in 1 : vector<64x16xf32>, vector<64x16xf32> -> vector<64x32xf32>
    %32 = vector.extract_strided_slice %28 {offsets = [0, 0], sizes = [64, 16], strides = [1, 1]} : vector<64x32xf32> to vector<64x16xf32>
    %33 = vector.extract_strided_slice %25 {offsets = [0, 16], sizes = [64, 16], strides = [1, 1]} : vector<64x32xf32> to vector<64x16xf32>
    %34 = tpu.concatenate %32, %33 in 1 : vector<64x16xf32>, vector<64x16xf32> -> vector<64x32xf32>
    %c0_24 = arith.constant 0 : index
    %c0_25 = arith.constant 0 : index
    %35 = vector.load %arg8[%c0_24, %c0_25] : memref<32x128xf32, #tpu.memory_space<vmem>>, vector<32x128xf32>
    %cst_26 = arith.constant dense<0.000000e+00> : vector<64x128xf32>
    %36 = tpu.matmul %31, %35, %cst_26 {dimension_numbers = #tpu.dot_dimension_numbers<[1], [0], [0], [1], [0, 0, 1, 1], [], []>} : vector<64x32xf32>, vector<32x128xf32>, vector<64x128xf32> -> vector<64x128xf32>
    %c0_27 = arith.constant 0 : index
    %c128_28 = arith.constant 128 : index
    %37 = vector.load %arg13[%c0_27, %c128_28] : memref<64x640xf32, #tpu.memory_space<vmem>>, vector<64x128xf32>
    tpu.vector_store %arg13[%c0_27, %c128_28], %36 {strides = array<i32>} : memref<64x640xf32, #tpu.memory_space<vmem>>, vector<64x128xf32>,
    %c0_29 = arith.constant 0 : index
    %c0_30 = arith.constant 0 : index
    %38 = vector.load %arg9[%c0_29, %c0_30] : memref<32x128xf32, #tpu.memory_space<vmem>>, vector<32x128xf32>
    %cst_31 = arith.constant dense<0.000000e+00> : vector<64x128xf32>
    %39 = tpu.matmul %34, %38, %cst_31 {dimension_numbers = #tpu.dot_dimension_numbers<[1], [0], [0], [1], [0, 0, 1, 1], [], []>} : vector<64x32xf32>, vector<32x128xf32>, vector<64x128xf32> -> vector<64x128xf32>
    %c0_32 = arith.constant 0 : index
    %c256_33 = arith.constant 256 : index
    %40 = vector.load %arg13[%c0_32, %c256_33] : memref<64x640xf32, #tpu.memory_space<vmem>>, vector<64x128xf32>
    tpu.vector_store %arg13[%c0_32, %c256_33], %39 {strides = array<i32>} : memref<64x640xf32, #tpu.memory_space<vmem>>, vector<64x128xf32>,
    %41 = vector.extract_strided_slice %11 {offsets = [0, 48], sizes = [64, 32], strides = [1, 1]} : vector<64x80xf32> to vector<64x32xf32>
    %c0_34 = arith.constant 0 : index
    %c384 = arith.constant 384 : index
    %42 = vector.load %arg1[%c0_34, %c384] : memref<64x640xf32, #tpu.memory_space<vmem>>, vector<64x128xf32>
    %c0_35 = arith.constant 0 : index
    %c512 = arith.constant 512 : index
    %43 = vector.load %arg1[%c0_35, %c512] : memref<64x640xf32, #tpu.memory_space<vmem>>, vector<64x128xf32>
    %c0_36 = arith.constant 0 : index
    %c0_37 = arith.constant 0 : index
    %44 = vector.load %arg10[%c0_36, %c0_37] : memref<128x32xf32, #tpu.memory_space<vmem>>, vector<128x32xf32>
    %cst_38 = arith.constant dense<0.000000e+00> : vector<64x32xf32>
    %45 = tpu.matmul %42, %44, %cst_38 {dimension_numbers = #tpu.dot_dimension_numbers<[1], [0], [0], [1], [0, 0, 1, 1], [], []>} : vector<64x128xf32>, vector<128x32xf32>, vector<64x32xf32> -> vector<64x32xf32>
    %46 = arith.mulf %45, %41 : vector<64x32xf32>
    %c0_39 = arith.constant 0 : index
    %c0_40 = arith.constant 0 : index
    %47 = vector.load %arg10[%c0_39, %c0_40] : memref<128x32xf32, #tpu.memory_space<vmem>>, vector<128x32xf32>
    %cst_41 = arith.constant dense<0.000000e+00> : vector<64x32xf32>
    %48 = tpu.matmul %43, %47, %cst_41 {dimension_numbers = #tpu.dot_dimension_numbers<[1], [0], [0], [1], [0, 0, 1, 1], [], []>} : vector<64x128xf32>, vector<128x32xf32>, vector<64x32xf32> -> vector<64x32xf32>
    %49 = arith.mulf %48, %41 : vector<64x32xf32>
    %50 = vector.extract_strided_slice %46 {offsets = [0, 0], sizes = [64, 16], strides = [1, 1]} : vector<64x32xf32> to vector<64x16xf32>
    %51 = vector.extract_strided_slice %49 {offsets = [0, 16], sizes = [64, 16], strides = [1, 1]} : vector<64x32xf32> to vector<64x16xf32>
    %52 = tpu.concatenate %50, %51 in 1 : vector<64x16xf32>, vector<64x16xf32> -> vector<64x32xf32>
    %53 = vector.extract_strided_slice %49 {offsets = [0, 0], sizes = [64, 16], strides = [1, 1]} : vector<64x32xf32> to vector<64x16xf32>
    %54 = vector.extract_strided_slice %46 {offsets = [0, 16], sizes = [64, 16], strides = [1, 1]} : vector<64x32xf32> to vector<64x16xf32>
    %55 = tpu.concatenate %53, %54 in 1 : vector<64x16xf32>, vector<64x16xf32> -> vector<64x32xf32>
    %c0_42 = arith.constant 0 : index
    %c0_43 = arith.constant 0 : index
    %56 = vector.load %arg11[%c0_42, %c0_43] : memref<32x128xf32, #tpu.memory_space<vmem>>, vector<32x128xf32>
    %cst_44 = arith.constant dense<0.000000e+00> : vector<64x128xf32>
    %57 = tpu.matmul %52, %56, %cst_44 {dimension_numbers = #tpu.dot_dimension_numbers<[1], [0], [0], [1], [0, 0, 1, 1], [], []>} : vector<64x32xf32>, vector<32x128xf32>, vector<64x128xf32> -> vector<64x128xf32>
    %c0_45 = arith.constant 0 : index
    %c384_46 = arith.constant 384 : index
    %58 = vector.load %arg13[%c0_45, %c384_46] : memref<64x640xf32, #tpu.memory_space<vmem>>, vector<64x128xf32>
    tpu.vector_store %arg13[%c0_45, %c384_46], %57 {strides = array<i32>} : memref<64x640xf32, #tpu.memory_space<vmem>>, vector<64x128xf32>,
    %c0_47 = arith.constant 0 : index
    %c0_48 = arith.constant 0 : index
    %59 = vector.load %arg12[%c0_47, %c0_48] : memref<32x128xf32, #tpu.memory_space<vmem>>, vector<32x128xf32>
    %cst_49 = arith.constant dense<0.000000e+00> : vector<64x128xf32>
    %60 = tpu.matmul %55, %59, %cst_49 {dimension_numbers = #tpu.dot_dimension_numbers<[1], [0], [0], [1], [0, 0, 1, 1], [], []>} : vector<64x32xf32>, vector<32x128xf32>, vector<64x128xf32> -> vector<64x128xf32>
    %c0_50 = arith.constant 0 : index
    %c512_51 = arith.constant 512 : index
    %61 = vector.load %arg13[%c0_50, %c512_51] : memref<64x640xf32, #tpu.memory_space<vmem>>, vector<64x128xf32>
    tpu.vector_store %arg13[%c0_50, %c512_51], %60 {strides = array<i32>} : memref<64x640xf32, #tpu.memory_space<vmem>>, vector<64x128xf32>,
    return
  }
  func.func @transform_0(%arg0: i32) -> (i32, i32) {
    %c0_i32 = arith.constant 0 : i32
    %c0_i32_0 = arith.constant 0 : i32
    return %arg0, %c0_i32 : i32, i32
  }
  func.func @transform_1(%arg0: i32) -> (i32, i32) {
    %c0_i32 = arith.constant 0 : i32
    %c0_i32_0 = arith.constant 0 : i32
    return %arg0, %c0_i32 : i32, i32
  }
  func.func @transform_2(%arg0: i32) -> (i32, i32) {
    %c0_i32 = arith.constant 0 : i32
    %c0_i32_0 = arith.constant 0 : i32
    %c0_i32_1 = arith.constant 0 : i32
    return %c0_i32, %c0_i32_0 : i32, i32
  }
  func.func @transform_3(%arg0: i32) -> (i32, i32) {
    %c0_i32 = arith.constant 0 : i32
    %c0_i32_0 = arith.constant 0 : i32
    %c0_i32_1 = arith.constant 0 : i32
    return %c0_i32, %c0_i32_0 : i32, i32
  }
  func.func @transform_4(%arg0: i32) -> (i32, i32) {
    %c0_i32 = arith.constant 0 : i32
    %c0_i32_0 = arith.constant 0 : i32
    %c0_i32_1 = arith.constant 0 : i32
    return %c0_i32, %c0_i32_0 : i32, i32
  }
  func.func @transform_5(%arg0: i32) -> (i32, i32) {
    %c0_i32 = arith.constant 0 : i32
    %c0_i32_0 = arith.constant 0 : i32
    %c0_i32_1 = arith.constant 0 : i32
    return %c0_i32, %c0_i32_0 : i32, i32
  }
  func.func @transform_6(%arg0: i32) -> (i32, i32) {
    %c0_i32 = arith.constant 0 : i32
    %c0_i32_0 = arith.constant 0 : i32
    %c0_i32_1 = arith.constant 0 : i32
    return %c0_i32, %c0_i32_0 : i32, i32
  }
  func.func @transform_7(%arg0: i32) -> (i32, i32) {
    %c0_i32 = arith.constant 0 : i32
    %c0_i32_0 = arith.constant 0 : i32
    %c0_i32_1 = arith.constant 0 : i32
    return %c0_i32, %c0_i32_0 : i32, i32
  }
  func.func @transform_8(%arg0: i32) -> (i32, i32) {
    %c0_i32 = arith.constant 0 : i32
    %c0_i32_0 = arith.constant 0 : i32
    %c0_i32_1 = arith.constant 0 : i32
    return %c0_i32, %c0_i32_0 : i32, i32
  }
  func.func @transform_9(%arg0: i32) -> (i32, i32) {
    %c0_i32 = arith.constant 0 : i32
    %c0_i32_0 = arith.constant 0 : i32
    %c0_i32_1 = arith.constant 0 : i32
    return %c0_i32, %c0_i32_0 : i32, i32
  }
  func.func @transform_10(%arg0: i32) -> (i32, i32) {
    %c0_i32 = arith.constant 0 : i32
    %c0_i32_0 = arith.constant 0 : i32
    %c0_i32_1 = arith.constant 0 : i32
    return %c0_i32, %c0_i32_0 : i32, i32
  }
  func.func @transform_11(%arg0: i32) -> (i32, i32) {
    %c0_i32 = arith.constant 0 : i32
    %c0_i32_0 = arith.constant 0 : i32
    %c0_i32_1 = arith.constant 0 : i32
    return %c0_i32, %c0_i32_0 : i32, i32
  }
  func.func @transform_12(%arg0: i32) -> (i32, i32) {
    %c0_i32 = arith.constant 0 : i32
    %c0_i32_0 = arith.constant 0 : i32
    return %arg0, %c0_i32 : i32, i32
  }
}

</mosaic_0001>

<bundles_post_ra>
// kernel: tpu_custom_call.1
= control target key start
LH: loop header
LB: loop body
LE: loop exit
PB: predicated region body
PF: predicated region fallthrough
CT: control target
= control target key end

     0   :  { %s4780_s0 = inlined_call_operand.hbm [shape: f32[256,640], index: 0, kind: input, shape index: {}]   ;;  %s4781_s1 = inlined_call_operand.hbm [shape: f32[256,16], index: 1, kind: input, shape index: {}]   ;;  %s4782_s2 = inlined_call_operand.hbm [shape: f32[16,80], index: 2, kind: input, shape index: {}]   ;;  %s4783_s3 = inlined_call_operand.hbm [shape: f32[1,80], index: 3, kind: input, shape index: {}]   ;;  %s4784_s4 = inlined_call_operand.hbm [shape: f32[128,16], index: 4, kind: input, shape index: {}]   ;;  %s4785_s5 = inlined_call_operand.hbm [shape: f32[16,128], index: 5, kind: input, shape index: {}]   ;;  %s4786_s6 = inlined_call_operand.hbm [shape: f32[128,32], index: 6, kind: input, shape index: {}]   ;;  %s4787_s7 = inlined_call_operand.hbm [shape: f32[32,128], index: 7, kind: input, shape index: {}]   ;;  %s4788_s8 = inlined_call_operand.hbm [shape: f32[32,128], index: 8, kind: input, shape index: {}]   ;;  %s4789_s9 = inlined_call_operand.hbm [shape: f32[128,32], index: 9, kind: input, shape index: {}]   ;;  %s4790_s10 = inlined_call_operand.hbm [shape: f32[32,128], index: 10, kind: input, shape index: {}]   ;;  %s4791_s11 = inlined_call_operand.hbm [shape: f32[32,128], index: 11, kind: input, shape index: {}]   ;;  %s4792_s12 = inlined_call_operand.hbm [shape: f32[256,640], index: 12, kind: output, shape index: {}]  }
   0x1   :  { %4803 = sst [smem:[#allocation33_spill]] %s4780_s0 }
   0x2   :  { %4804 = sst [smem:[#allocation34_spill]] %s4781_s1 }
   0x3   :  { %4805 = sst [smem:[#allocation35_spill]] %s4782_s2 }
   0x4   :  { %4806 = sst [smem:[#allocation36_spill]] %s4783_s3 }
   0x5   :  { %4807 = sst [smem:[#allocation37_spill]] %s4784_s4 }
   0x6   :  { %4808 = sst [smem:[#allocation38_spill]] %s4785_s5 }
   0x7   :  { %4809 = sst [smem:[#allocation39_spill]] %s4786_s6 }
   0x8   :  { %4810 = sst [smem:[#allocation40_spill]] %s4787_s7 }
   0x9   :  { %4811 = sst [smem:[#allocation41_spill]] %s4788_s8 }
   0xa   :  { %4812 = sst [smem:[#allocation42_spill]] %s4792_s12 }
   0xb   :  { %17 = vsyncpa [#allocation3], 0 }
   0xc   :  { %19 = vsyncpa [#allocation3 + $0x1], 0 }
   0xd   :  { %20 = vsyncpa [#allocation6], 0 }
   0xe   :  { %22 = vsyncpa [#allocation6 + $0x1], 0 }
   0xf   :  { %23 = vsyncpa [#allocation9], 0 }
  0x10   :  { %24 = vsyncpa [#allocation12], 0 }
  0x11   :  { %25 = vsyncpa [#allocation15], 0 }
  0x12   :  { %26 = vsyncpa [#allocation18], 0 }
  0x13   :  { %27 = vsyncpa [#allocation21], 0 }
  0x14   :  { %28 = vsyncpa [#allocation4], 0 }
  0x15   :  { %30 = vsyncpa [#allocation4 + $0x1], 0  ;;  %s4009_s21 = smov 0   ;;  %s4011_s22 = smov 0  }
  0x16   :  { %s4013_s23 = smov 0   ;;  %s4015_s24 = smov 0  }
  0x17 LB: > { %s3923_s25 = smov [#allocation7]   ;;  %s4030_s27 = sadd.s32 4294967295, %s3921_s24   ;;  %s3921_s24 = sphi %s4015_s24, %s4854_s24   ;;  %s3917_s23 = sphi %s4013_s23, %s4853_s23   ;;  %s3913_s22 = sphi %s4011_s22, %s4852_s22   ;;  %s3909_s21 = sphi %s4009_s21, %s4851_s21  }
  0x18   : > { %s341_s26 = sshll.u32 %s3923_s25, 4  ;;  %p2474_p0 = scmp.ge.s32.totalorder %s3921_s24, 1  ;;  %s4035_s26 = int_to_ptr.vmem [resolvable:$true] %s341_s26 }
  0x19   : > { %p4797_p1 = scmp.eq.s32.totalorder %s4030_s27, 0  ;;  %p329_p2 = scmp.lt.s32.totalorder %s3921_s24, 5 }
  0x1a   : > { %s3924_s29 = smov [#allocation8]   ;;  %s3925_s14 = smov [#allocation11]  }
  0x1b   : > { %p4037_p3 = pnand %p2474_p0, %p329_p2  ;;  %s355_s30 = sshll.u32 %s3924_s29, 4  ;;  %s4049_s30 = int_to_ptr.vmem [resolvable:$true] %s355_s30 }
  0x1c   : > { %s378_s15 = sshll.u32 %s3925_s14, 4  ;;  %s4816_s2 = sld [smem:[#allocation35_spill]]  ;;  %s4051_s15 = int_to_ptr.vmem [resolvable:$true] %s378_s15 }
  0x1d   : > { %s4813_s28 = scalar_select %p4037_p3, 1, 0 }
  0x1e   : > { %p3341_p4 = pneg %p4037_p3 }
  0x1f   : > { %4814 = sst [smem:[#allocation32_spill]] %s4813_s28 }
  0x20   : > { %p4045_p5 = pnand %p3341_p4, %p4797_p1 }
  0x22   : > { %s3487_s18 = scalar_lea.hbm %s4816_s2, 256  ;;  %p4061_p7 = pneg %p4045_p5 }
  0x23   : > { %p3488_p6 = scmp.ne.s32.totalorder %s4816_s2, %s3487_s18  ;;  %p3494_p10 = scmp.lt.u32.totalorder %s3487_s18, %s4816_s2 }
  0x25   : > { %p3490_p8 = pnand %p4061_p7, %p3488_p6 }
  0x27   : > { %p3491_p9 = pneg %p3490_p8 }
  0x29   : > { %p3496_p11 = pnand %p3494_p10, %p3491_p9 }
  0x2b   : > { %3499 = shalt.err (!%p3496_p11)
}
  0x2c   : > { %s3500_s16 = scalar_lea.vmem %s4035_s26, 256  ;;  %p3508_p2 = scmp.lt.s32.totalorder %s4035_s26, %s4035_s26 }
  0x2d   : > { %p3501_p12 = scmp.ne.s32.totalorder %s4035_s26, %s3500_s16  ;;  %p3509_p4 = scmp.lt.s32.totalorder %s3500_s16, %s3500_s16 }
  0x2f   : > { %p3503_p13 = pnand %p3501_p12, %p4061_p7  ;;  %p3510_p6 = por %p3509_p4, %p3508_p2 }
  0x31   : > { %p3504_p0 = pneg %p3503_p13 }
  0x33   : > { %p3511_p8 = pnand %p3510_p6, %p3504_p0 }
  0x35   : > { %3514 = shalt.err (!%p3511_p8)
}
  0x36   : > { %s4799_s17 = smov 128   ;;  %s4800_s18 = smov 8  }
  0x37   : > { %3344 = dma.hbm_to_vmem [thread:$0]  (!%p4045_p5), %s4816_s2, 256, %s4035_s26, [#allocation6], %s4799_s17, %s4799_s17, %s4800_s18  }
  0x38   : > { %s4818_s3 = sld [smem:[#allocation36_spill]] }
  0x3e   : > { %s3515_s16 = scalar_lea.hbm %s4818_s3, 16 }
  0x3f   : > { %p3516_p9 = scmp.ne.s32.totalorder %s4818_s3, %s3515_s16  ;;  %p3522_p12 = scmp.lt.u32.totalorder %s3515_s16, %s4818_s3 }
  0x41   : > { %p3518_p10 = pnand %p3516_p9, %p4061_p7 }
  0x43   : > { %p3519_p11 = pneg %p3518_p10 }
  0x45   : > { %p3524_p13 = pnand %p3522_p12, %p3519_p11 }
  0x47   : > { %3527 = shalt.err (!%p3524_p13)
}
  0x48   : > { %s3528_s26 = scalar_lea.vmem %s4049_s30, 16  ;;  %s3535_s12 = scalar_lea.vmem %s4049_s30, 32 }
  0x49   : > { %p3529_p0 = scmp.ne.s32.totalorder %s4049_s30, %s3528_s26  ;;  %p3536_p6 = scmp.lt.s32.totalorder %s4049_s30, %s4049_s30 }
  0x4a   : > { %p3537_p8 = scmp.lt.s32.totalorder %s3535_s12, %s3528_s26 }
  0x4b   : > { %p3531_p2 = pnand %p3529_p0, %p4061_p7 }
  0x4c   : > { %p3538_p9 = por %p3537_p8, %p3536_p6 }
  0x4d   : > { %p3532_p4 = pneg %p3531_p2 }
  0x4f   : > { %p3539_p10 = pnand %p3538_p9, %p3532_p4 }
  0x51   : > { %3542 = shalt.err (!%p3539_p10)
}
  0x52   : > { %3347 = dma.hbm_to_vmem [thread:$0]  (!%p4045_p5), %s4818_s3, 16, %s4049_s30, [#allocation9]  }
  0x53   : > { %s4819_s5 = sld [smem:[#allocation38_spill]] }
  0x59   : > { %s3543_s20 = scalar_lea.hbm %s4819_s5, 256 }
  0x5a   : > { %p3544_p11 = scmp.ne.s32.totalorder %s4819_s5, %s3543_s20  ;;  %p3550_p0 = scmp.lt.u32.totalorder %s3543_s20, %s4819_s5 }
  0x5c   : > { %p3546_p12 = pnand %p3544_p11, %p4061_p7 }
  0x5e   : > { %p3547_p13 = pneg %p3546_p12 }
  0x60   : > { %p3552_p2 = pnand %p3550_p0, %p3547_p13 }
  0x62   : > { %3555 = shalt.err (!%p3552_p2)
}
  0x63   : > { %s3556_s30 = scalar_lea.vmem %s4051_s15, 256  ;;  %p3564_p9 = scmp.lt.s32.totalorder %s4051_s15, %s4051_s15 }
  0x64   : > { %p3557_p4 = scmp.ne.s32.totalorder %s4051_s15, %s3556_s30  ;;  %p3565_p10 = scmp.lt.s32.totalorder %s3556_s30, %s3556_s30 }
  0x66   : > { %p3559_p6 = pnand %p3557_p4, %p4061_p7  ;;  %p3566_p11 = por %p3565_p10, %p3564_p9 }
  0x68   : > { %p3560_p8 = pneg %p3559_p6 }
  0x6a   : > { %p3567_p12 = pnand %p3566_p11, %p3560_p8 }
  0x6c   : > { %3570 = shalt.err (!%p3567_p12)
}
  0x6d   : > { %3353 = dma.hbm_to_vmem [thread:$0]  (!%p4045_p5), %s4819_s5, 256, %s4051_s15, [#allocation12], %s4799_s17, %s4799_s17, %s4800_s18  }
  0x6e   : > { %s3928_s1 = smov [#allocation14]   ;;  %s3929_s19 = smov [#allocation17]  }
  0x6f   : > { %s404_s28 = sshll.u32 %s3928_s1, 4  ;;  %s430_s20 = sshll.u32 %s3929_s19, 4  ;;  %s405_s28 = int_to_ptr.vmem [resolvable:$true] %s404_s28  ;;  %s431_s20 = int_to_ptr.vmem [resolvable:$true] %s430_s20 }
  0x70   : > { %s4820_s7 = sld [smem:[#allocation40_spill]] }
  0x76   : > { %s3571_s16 = scalar_lea.hbm %s4820_s7, 512 }
  0x77   : > { %p3572_p13 = scmp.ne.s32.totalorder %s4820_s7, %s3571_s16  ;;  %p3578_p4 = scmp.lt.u32.totalorder %s3571_s16, %s4820_s7 }
  0x79   : > { %p3574_p0 = pnand %p3572_p13, %p4061_p7 }
  0x7b   : > { %p3575_p2 = pneg %p3574_p0 }
  0x7d   : > { %p3580_p6 = pnand %p3578_p4, %p3575_p2 }
  0x7f   : > { %3583 = shalt.err (!%p3580_p6)
}
  0x80   : > { %s3584_s15 = scalar_lea.vmem %s405_s28, 512  ;;  %p3592_p11 = scmp.lt.s32.totalorder %s405_s28, %s405_s28 }
  0x81   : > { %p3585_p8 = scmp.ne.s32.totalorder %s405_s28, %s3584_s15  ;;  %p3593_p12 = scmp.lt.s32.totalorder %s3584_s15, %s3584_s15 }
  0x83   : > { %p3587_p9 = pnand %p3585_p8, %p4061_p7  ;;  %p3594_p1 = por %p3593_p12, %p3592_p11 }
  0x85   : > { %p3588_p10 = pneg %p3587_p9 }
  0x87   : > { %p3595_p3 = pnand %p3594_p1, %p3588_p10 }
  0x89   : > { %3598 = shalt.err (!%p3595_p3)
}
  0x8a   : > { %3359 = dma.hbm_to_vmem [thread:$0]  (!%p4045_p5), %s4820_s7, 512, %s405_s28, [#allocation15], %s4799_s17, %s4799_s17, %s4800_s18  }
  0x8b   : > { %s3599_s29 = scalar_lea.hbm %s4789_s9, 2048 }
  0x8c   : > { %p3600_p1 = scmp.ne.s32.totalorder %s4789_s9, %s3599_s29  ;;  %p3606_p0 = scmp.lt.u32.totalorder %s3599_s29, %s4789_s9 }
  0x8e   : > { %p3602_p3 = pnand %p3600_p1, %p4061_p7 }
  0x90   : > { %p3603_p13 = pneg %p3602_p3 }
  0x92   : > { %p3608_p2 = pnand %p3606_p0, %p3603_p13 }
  0x94   : > { %3611 = shalt.err (!%p3608_p2)
}
  0x95   : > { %s3612_s12 = scalar_lea.vmem %s431_s20, 2048  ;;  %p3620_p9 = scmp.lt.s32.totalorder %s431_s20, %s431_s20 }
  0x96   : > { %p3613_p4 = scmp.ne.s32.totalorder %s431_s20, %s3612_s12  ;;  %p3621_p10 = scmp.lt.s32.totalorder %s3612_s12, %s3612_s12 }
  0x98   : > { %p3615_p6 = pnand %p3613_p4, %p4061_p7  ;;  %p3622_p11 = por %p3621_p10, %p3620_p9 }
  0x9a   : > { %p3616_p8 = pneg %p3615_p6 }
  0x9c   : > { %p3623_p12 = pnand %p3622_p11, %p3616_p8 }
  0x9e   : > { %3626 = shalt.err (!%p3623_p12)
}
  0x9f   : > { %3365 = dma.hbm_to_vmem [thread:$0]  (!%p4045_p5), %s4789_s9, 2048, %s431_s20, [#allocation18], %s4799_s17, %s4799_s17, %s4800_s18  }
  0xa0   : > { %s3930_s2 = smov [#allocation10]   ;;  %s3931_s1 = smov [#allocation13]  }
  0xa1   : > { %s365_s0 = sshll.u32 %s3930_s2, 4  ;;  %s391_s19 = sshll.u32 %s3931_s1, 4  ;;  %s366_s0 = int_to_ptr.vmem [resolvable:$true] %s365_s0  ;;  %s392_s19 = int_to_ptr.vmem [resolvable:$true] %s391_s19 }
  0xa2   : > { %s4821_s4 = sld [smem:[#allocation37_spill]] }
  0xa8   : > { %s3627_s16 = scalar_lea.hbm %s4821_s4, 2048 }
  0xa9   : > { %p3628_p1 = scmp.ne.s32.totalorder %s4821_s4, %s3627_s16  ;;  %p3634_p0 = scmp.lt.u32.totalorder %s3627_s16, %s4821_s4 }
  0xab   : > { %p3630_p3 = pnand %p3628_p1, %p4061_p7 }
  0xad   : > { %p3631_p13 = pneg %p3630_p3 }
  0xaf   : > { %p3636_p2 = pnand %p3634_p0, %p3631_p13 }
  0xb1   : > { %3639 = shalt.err (!%p3636_p2)
}
  0xb2   : > { %s3640_s20 = scalar_lea.vmem %s366_s0, 2048  ;;  %p3648_p9 = scmp.lt.s32.totalorder %s366_s0, %s366_s0 }
  0xb3   : > { %p3641_p4 = scmp.ne.s32.totalorder %s366_s0, %s3640_s20  ;;  %p3649_p10 = scmp.lt.s32.totalorder %s3640_s20, %s3640_s20 }
  0xb5   : > { %p3643_p6 = pnand %p3641_p4, %p4061_p7  ;;  %p3650_p11 = por %p3649_p10, %p3648_p9 }
  0xb7   : > { %p3644_p8 = pneg %p3643_p6 }
  0xb9   : > { %p3651_p12 = pnand %p3650_p11, %p3644_p8 }
  0xbb   : > { %3654 = shalt.err (!%p3651_p12)
}
  0xbc   : > { %3350 = dma.hbm_to_vmem [thread:$0]  (!%p4045_p5), %s4821_s4, 2048, %s366_s0, [#allocation9], %s4799_s17, %s4799_s17, %s4800_s18  }
  0xbd   : > { %s4822_s6 = sld [smem:[#allocation39_spill]] }
  0xc3   : > { %s3655_s14 = scalar_lea.hbm %s4822_s6, 2048 }
  0xc4   : > { %p3656_p1 = scmp.ne.s32.totalorder %s4822_s6, %s3655_s14  ;;  %p3662_p0 = scmp.lt.u32.totalorder %s3655_s14, %s4822_s6 }
  0xc6   : > { %p3658_p3 = pnand %p3656_p1, %p4061_p7 }
  0xc8   : > { %p3659_p13 = pneg %p3658_p3 }
  0xca   : > { %p3664_p2 = pnand %p3662_p0, %p3659_p13 }
  0xcc   : > { %3667 = shalt.err (!%p3664_p2)
}
  0xcd   : > { %s3668_s28 = scalar_lea.vmem %s392_s19, 2048  ;;  %p3676_p9 = scmp.lt.s32.totalorder %s392_s19, %s392_s19 }
  0xce   : > { %p3669_p4 = scmp.ne.s32.totalorder %s392_s19, %s3668_s28  ;;  %p3677_p10 = scmp.lt.s32.totalorder %s3668_s28, %s3668_s28 }
  0xd0   : > { %p3671_p6 = pnand %p3669_p4, %p4061_p7  ;;  %p3678_p11 = por %p3677_p10, %p3676_p9 }
  0xd2   : > { %p3672_p8 = pneg %p3671_p6 }
  0xd4   : > { %p3679_p12 = pnand %p3678_p11, %p3672_p8 }
  0xd6   : > { %3682 = shalt.err (!%p3679_p12)
}
  0xd7   : > { %3356 = dma.hbm_to_vmem [thread:$0]  (!%p4045_p5), %s4822_s6, 2048, %s392_s19, [#allocation12], %s4799_s17, %s4799_s17, %s4800_s18  }
  0xd8   : > { %s3932_s15 = smov [#allocation16]   ;;  %s3933_s1 = smov [#allocation19]  }
  0xd9   : > { %s417_s2 = sshll.u32 %s3932_s15, 4  ;;  %s443_s29 = sshll.u32 %s3933_s1, 4  ;;  %s418_s2 = int_to_ptr.vmem [resolvable:$true] %s417_s2  ;;  %s444_s29 = int_to_ptr.vmem [resolvable:$true] %s443_s29 }
  0xda   : > { %s4823_s8 = sld [smem:[#allocation41_spill]] }
  0xe0   : > { %s3683_s26 = scalar_lea.hbm %s4823_s8, 512 }
  0xe1   : > { %p3684_p1 = scmp.ne.s32.totalorder %s4823_s8, %s3683_s26  ;;  %p3690_p0 = scmp.lt.u32.totalorder %s3683_s26, %s4823_s8 }
  0xe3   : > { %p3686_p3 = pnand %p3684_p1, %p4061_p7 }
  0xe5   : > { %p3687_p13 = pneg %p3686_p3 }
  0xe7   : > { %p3692_p2 = pnand %p3690_p0, %p3687_p13 }
  0xe9   : > { %3695 = shalt.err (!%p3692_p2)
}
  0xea   : > { %s3696_s19 = scalar_lea.vmem %s418_s2, 512  ;;  %p3704_p9 = scmp.lt.s32.totalorder %s418_s2, %s418_s2 }
  0xeb   : > { %p3697_p4 = scmp.ne.s32.totalorder %s418_s2, %s3696_s19  ;;  %p3705_p10 = scmp.lt.s32.totalorder %s3696_s19, %s3696_s19 }
  0xed   : > { %p3699_p6 = pnand %p3697_p4, %p4061_p7  ;;  %p3706_p11 = por %p3705_p10, %p3704_p9 }
  0xef   : > { %p3700_p8 = pneg %p3699_p6 }
  0xf1   : > { %p3707_p12 = pnand %p3706_p11, %p3700_p8 }
  0xf3   : > { %3710 = shalt.err (!%p3707_p12)
}
  0xf4   : > { %3362 = dma.hbm_to_vmem [thread:$0]  (!%p4045_p5), %s4823_s8, 512, %s418_s2, [#allocation15], %s4799_s17, %s4799_s17, %s4800_s18  }
  0xf5   : > { %s3711_s16 = scalar_lea.hbm %s4790_s10, 512 }
  0xf6   : > { %p3712_p1 = scmp.ne.s32.totalorder %s4790_s10, %s3711_s16  ;;  %p3718_p0 = scmp.lt.u32.totalorder %s3711_s16, %s4790_s10 }
  0xf8   : > { %p3714_p3 = pnand %p3712_p1, %p4061_p7 }
  0xfa   : > { %p3715_p13 = pneg %p3714_p3 }
  0xfc   : > { %p3720_p2 = pnand %p3718_p0, %p3715_p13 }
  0xfe   : > { %3723 = shalt.err (!%p3720_p2)
}
  0xff   : > { %s3724_s0 = scalar_lea.vmem %s444_s29, 512  ;;  %p3732_p9 = scmp.lt.s32.totalorder %s444_s29, %s444_s29 }
 0x100   : > { %p3725_p4 = scmp.ne.s32.totalorder %s444_s29, %s3724_s0  ;;  %p3733_p10 = scmp.lt.s32.totalorder %s3724_s0, %s3724_s0 }
 0x102   : > { %p3727_p6 = pnand %p3725_p4, %p4061_p7  ;;  %p3734_p11 = por %p3733_p10, %p3732_p9 }
 0x104   : > { %p3728_p8 = pneg %p3727_p6 }
 0x106   : > { %p3735_p12 = pnand %p3734_p11, %p3728_p8 }
 0x108   : > { %3738 = shalt.err (!%p3735_p12)
}
 0x109   : > { %3368 = dma.hbm_to_vmem [thread:$0]  (!%p4045_p5), %s4790_s10, 512, %s444_s29, [#allocation18], %s4799_s17, %s4799_s17, %s4800_s18  }
 0x10a   : > { %s3934_s20 = smov [#allocation20]   ;;  %s3739_s16 = scalar_lea.hbm %s4791_s11, 512 }
 0x10b   : > { %s456_s15 = sshll.u32 %s3934_s20, 4  ;;  %p3740_p1 = scmp.ne.s32.totalorder %s4791_s11, %s3739_s16  ;;  %s457_s15 = int_to_ptr.vmem [resolvable:$true] %s456_s15 }
 0x10c   : > { %p3746_p0 = scmp.lt.u32.totalorder %s3739_s16, %s4791_s11 }
 0x10d   : > { %p3742_p3 = pnand %p3740_p1, %p4061_p7 }
 0x10f   : > { %p3743_p13 = pneg %p3742_p3 }
 0x111   : > { %p3748_p2 = pnand %p3746_p0, %p3743_p13 }
 0x113   : > { %3751 = shalt.err (!%p3748_p2)
}
 0x114   : > { %s3752_s29 = scalar_lea.vmem %s457_s15, 512  ;;  %p3760_p9 = scmp.lt.s32.totalorder %s457_s15, %s457_s15 }
 0x115   : > { %p3753_p4 = scmp.ne.s32.totalorder %s457_s15, %s3752_s29  ;;  %p3761_p10 = scmp.lt.s32.totalorder %s3752_s29, %s3752_s29 }
 0x117   : > { %p3755_p6 = pnand %p3753_p4, %p4061_p7  ;;  %p3762_p11 = por %p3761_p10, %p3760_p9 }
 0x119   : > { %p3756_p8 = pneg %p3755_p6 }
 0x11b   : > { %p3763_p12 = pnand %p3762_p11, %p3756_p8 }
 0x11d   : > { %3766 = shalt.err (!%p3763_p12)
}
 0x11e   : > { %3371 = dma.hbm_to_vmem [thread:$0]  (!%p4045_p5), %s4791_s11, 512, %s457_s15, [#allocation21], %s4799_s17, %s4799_s17, %s4800_s18  }
 0x11f   : > { %s2473_s13 = sadd.s32 4294967294, %s3921_s24   ;;  %s4284_s25 = sadd.s32 1, %s3921_s24  }
 0x120   : > { %s40_s19 = ssub.s32 %s3921_s24, %s4284_s25  ;;  %s43_s20 = sadd.s32 1, %s3917_s23 }
 0x121   : > { %p41_p7 = scmp.eq.s32.totalorder %s40_s19, 0  ;;  %p50_p1 = scmp.ne.s32.totalorder %s3917_s23, %s3913_s22 }
 0x122   : > { %p51_p3 = scmp.eq.s32.totalorder %s3921_s24, 0  ;;  %p56_p13 = scmp.ne.s32.totalorder %s3913_s22, %s3909_s21 }
 0x123   : > { %s4295_s1 = scalar_select %p41_p7, %s3917_s23, %s43_s20  }
 0x124   : > { %p52_p0 = por %p51_p3, %p50_p1  ;;  %p4824_p2 = scmp.eq.s32.totalorder %s4030_s27, 0 }
 0x125   : > { %p316_p5 = scmp.eq.s32.totalorder %s4030_s27, 3  ;;  %p322_p6 = scmp.eq.s32.totalorder %s2473_s13, 3 }
 0x126   : > { %p4299_p4 = por %p4824_p2, %p56_p13  ;;  %p3393_p8 = scmp.lt.s32.totalorder %s3921_s24, 4 }
 0x127   : > { %s4306_s15 = sand.u32 1, %s3917_s23   ;;  %p4308_p9 = por %p316_p5, %p50_p1 }
 0x128   : > { %p4312_p10 = por %p322_p6, %p56_p13  ;;  %s3291_s30 = smul.u32 320, %s4306_s15 }
 0x129   : > { %s4826_s16 = scalar_select %p4308_p9, 1, 0 }
 0x12a   : > { %s4827_s26 = scalar_select %p4312_p10, 1, 0 }
 0x12b   : > { %s3292_s12 = smul.u32 5120, %s3921_s24  ;;  %p4318_p11 = pnand %p3393_p8, %p52_p0 }
 0x12c   : > { %s4829_s2 = sld [smem:[#allocation33_spill]]  ;;  %s474_s19 = scalar_lea.vmem [#allocation2], %s3291_s30 }
 0x12d   : > { %s482_s20 = sshll.u32 %s474_s19, 4  ;;  %s471_s18 = scalar_lea.sflag [#allocation3], %s4306_s15  ;;  %s4327_s20 = int_to_ptr.vmem [resolvable:$true] %s482_s20 }
 0x12e   : > { %p3769_p7 = pneg %p4318_p11 }
 0x132   : > { %s4325_s13 = scalar_lea.hbm %s4829_s2, %s3292_s12  ;;  %s3772_s0 = scalar_lea.hbm %s4829_s2, 20480 }
 0x133   : > { %s3767_s3 = scalar_lea.hbm %s4325_s13, 5120  ;;  %p3773_p13 = scmp.lt.u32.totalorder %s4325_s13, %s4829_s2 }
 0x134   : > { %p3768_p12 = scmp.ne.s32.totalorder %s4325_s13, %s3767_s3  ;;  %p3774_p0 = scmp.lt.u32.totalorder %s3772_s0, %s3767_s3 }
 0x135   : > { %p3776_p5 = scmp.lt.u32.totalorder %s3767_s3, %s4325_s13 }
 0x136   : > { %p3770_p1 = pnand %p3769_p7, %p3768_p12  ;;  %p3775_p2 = por %p3774_p0, %p3773_p13 }
 0x138   : > { %p3771_p3 = pneg %p3770_p1  ;;  %p3777_p6 = por %p3776_p5, %p3775_p2 }
 0x13a   : > { %p3778_p8 = pnand %p3777_p6, %p3771_p3 }
 0x13c   : > { %3781 = shalt.err (!%p3778_p8)
}
 0x13d   : > { %s3782_s30 = scalar_lea.vmem %s4327_s20, 5120  ;;  %s3935_s19 = smov [#allocation2]  }
 0x13e   : > { %p3783_p12 = scmp.ne.s32.totalorder %s4327_s20, %s3782_s30  ;;  %s3787_s12 = sshll.u32 %s3935_s19, 4  ;;  %s3788_s12 = int_to_ptr.vmem [resolvable:$false] %s3787_s12 }
 0x13f   : > { %s3789_s4 = scalar_lea.vmem %s3788_s12, 10240  ;;  %p3790_p9 = scmp.lt.s32.totalorder %s4327_s20, %s3788_s12 }
 0x140   : > { %p3785_p1 = pnand %p3783_p12, %p3769_p7  ;;  %p3791_p13 = scmp.lt.s32.totalorder %s3789_s4, %s3782_s30 }
 0x142   : > { %p3786_p10 = pneg %p3785_p1  ;;  %p3792_p0 = por %p3791_p13, %p3790_p9 }
 0x144   : > { %p3793_p2 = pnand %p3792_p0, %p3786_p10 }
 0x146   : > { %3796 = shalt.err (!%p3793_p2)
}
 0x147   : > { %s3936_s3 = smov 640   ;;  %s3937_s5 = smov 40  }
 0x148   : > { %3375 = dma.hbm_to_vmem [thread:$0]  (!%p4318_p11), %s4325_s13, 5120, %s4327_s20, %s471_s18, %s3936_s3, %s3936_s3, %s3937_s5  }
 0x149   : > { %s2489_s29 = sshll.u32 %s4306_s15, 6  ;;  %s2566_s0 = sshll.u32 %s3921_s24, 10 }
 0x14a   : > { %s4830_s12 = sld [smem:[#allocation34_spill]]  ;;  %s496_s17 = scalar_lea.vmem [#allocation5], %s2489_s29 }
 0x14b   : > { %s503_s2 = sshll.u32 %s496_s17, 4  ;;  %s4831_s6 = sand.u32 1, %s3921_s24   ;;  %s4365_s2 = int_to_ptr.vmem [resolvable:$true] %s503_s2 }
 0x14c   : > { %s4369_s7 = scalar_lea.sflag [#allocation6], %s4831_s6 }
 0x150   : > { %s4363_s4 = scalar_lea.hbm %s4830_s12, %s2566_s0  ;;  %s3802_s13 = scalar_lea.hbm %s4830_s12, 4096 }
 0x151   : > { %s3797_s8 = scalar_lea.hbm %s4363_s4, 1024  ;;  %p3803_p5 = scmp.lt.u32.totalorder %s4363_s4, %s4830_s12 }
 0x152   : > { %p3798_p9 = scmp.ne.s32.totalorder %s4363_s4, %s3797_s8  ;;  %p3804_p6 = scmp.lt.u32.totalorder %s3802_s13, %s3797_s8 }
 0x153   : > { %p3806_p12 = scmp.lt.u32.totalorder %s3797_s8, %s4363_s4 }
 0x154   : > { %p3800_p10 = pnand %p3798_p9, %p3769_p7  ;;  %p3805_p8 = por %p3804_p6, %p3803_p5 }
 0x156   : > { %p3801_p3 = pneg %p3800_p10  ;;  %p3807_p1 = por %p3806_p12, %p3805_p8 }
 0x158   : > { %p3808_p13 = pnand %p3807_p1, %p3801_p3 }
 0x15a   : > { %3811 = shalt.err (!%p3808_p13)
}
 0x15b   : > { %s3812_s6 = scalar_lea.vmem %s4365_s2, 1024  ;;  %s3938_s17 = smov [#allocation5]  }
 0x15c   : > { %p3813_p0 = scmp.ne.s32.totalorder %s4365_s2, %s3812_s6  ;;  %s3817_s5 = sshll.u32 %s3938_s17, 4  ;;  %s3818_s5 = int_to_ptr.vmem [resolvable:$false] %s3817_s5 }
 0x15d   : > { %s3819_s29 = scalar_lea.vmem %s3818_s5, 2048  ;;  %p3820_p10 = scmp.lt.s32.totalorder %s4365_s2, %s3818_s5 }
 0x15e   : > { %p3815_p2 = pnand %p3813_p0, %p3769_p7  ;;  %p3821_p5 = scmp.lt.s32.totalorder %s3819_s29, %s3812_s6 }
 0x160   : > { %p3816_p9 = pneg %p3815_p2  ;;  %p3822_p6 = por %p3821_p5, %p3820_p10 }
 0x162   : > { %p3823_p8 = pnand %p3822_p6, %p3816_p9 }
 0x164   : > { %3826 = shalt.err (!%p3823_p8)
}
 0x165   : > { %s4832_s8 = smov 8   ;;  %s4833_s0 = smov 128  }
 0x166   : > { %3378 = dma.hbm_to_vmem [thread:$0]  (!%p4318_p11), %s4363_s4, 1024, %s4365_s2, %s4369_s7, %s4833_s0, %s4833_s0, %s4832_s8  }
 0x167   : > { %s4834_s19 = sld [smem:[#allocation32_spill]] }
 0x16d   : > { %p4835_p7 = scmp.ne.s32.totalorder %s4834_s19, 0 }
 0x16e   : > { %s4401_s30 = sand.u32 (!%p4835_p7), 1, %s3913_s22  }
 0x16f   : > { %515 = sbr.rel (%p4835_p7) target bundleno = 1392 (0x570), region = 68  ;;  %s518_s15 = scalar_lea.sflag (!%p4835_p7), [#allocation3], %s4401_s30 }
 0x170   : > { %s3293_s18 = smul.u32 (!%p4835_p7), 320, %s4401_s30 }
 0x172   : > { %s4407_s28 = scalar_lea.vmem (!%p4835_p7), [#allocation2], %s3293_s18 }
 0x176   : > { %3872 = dma.done.wait (%p4299_p4), %s518_s15, 5120  }
 0x177   : > { %3874 = vsyncadd (%p4299_p4), %s518_s15, 4294962176  ;;  %s526_s7 = sand.u32 1, %s4030_s27   ;;  %s2493_s2 = sshll.u32 %s4401_s30, 6 }
 0x178   : > { %s527_s4 = scalar_lea.sflag [#allocation6], %s526_s7  ;;  %s4415_s13 = scalar_lea.vmem [#allocation5], %s2493_s2 }
 0x179   : > { %3876 = dma.done.wait (%p4299_p4), %s527_s4, 1024  }
 0x17a   : > { %3878 = vsyncadd (%p4299_p4), %s527_s4, 4294966272  ;;  %p4836_p11 = scmp.eq.s32.totalorder %s4030_s27, 0 }
 0x17c   : > { %3880 = dma.done.wait (%p4836_p11), [#allocation6], 256   ;;  %p4837_p3 = pmov %p4836_p11 }
 0x17e   : > { %3882 = vsyncadd (%p4837_p3), [#allocation6], 4294967040  ;;  %p4838_p12 = pmov %p4837_p3 }
 0x17f   : > { %p4839_p1 = pmov %p4837_p3 }
 0x180   : > { %3884 = dma.done.wait (%p4838_p12), [#allocation9], 2064  }
 0x181   : > { %3886 = vsyncadd (%p4839_p1), [#allocation9], 4294965232  ;;  %p4840_p13 = pmov %p4839_p1 }
 0x182   : > { %p4841_p0 = pmov %p4839_p1 }
 0x183   : > { %3888 = dma.done.wait (%p4840_p13), [#allocation12], 2304  }
 0x184   : > { %3890 = vsyncadd (%p4841_p0), [#allocation12], 4294964992  ;;  %p4842_p4 = pmov %p4841_p0 }
 0x185   : > { %p4843_p2 = pmov %p4841_p0 }
 0x186   : > { %3892 = dma.done.wait (%p4842_p4), [#allocation15], 1024  }
 0x187   : > { %3894 = vsyncadd (%p4843_p2), [#allocation15], 4294966272  ;;  %p4844_p9 = pmov %p4841_p0 }
 0x188   : > { %p4845_p10 = pmov %p4841_p0 }
 0x189   : > { %3896 = dma.done.wait (%p4844_p9), [#allocation18], 2560  }
 0x18a   : > { %3898 = vsyncadd (%p4845_p10), [#allocation18], 4294964736  ;;  %p4846_p5 = pmov %p4841_p0 }
 0x18b   : > { %p4847_p6 = pmov %p4841_p0 }
 0x18c   : > { %3900 = dma.done.wait (%p4846_p5), [#allocation21], 512  }
 0x18d   : > { %3902 = vsyncadd (%p4847_p6), [#allocation21], 4294966784  ;;  %vm636_vm0 = vcmask 130048   ;;  %v627_v0 = vld [vmem:[#allocation7] sm:$0xff]  ;;  %v628_v1 = vld [vmem:[#allocation7 + $0x8] sm:$0xff]  ;;  %s3939_s14 = smov 112  }
 0x18e   : > { %v830_v2 = vld [vmem:[#allocation10] sm:$0xff]  ;;  %v3087_v3 = vpack.c.bf16 %v628_v1, %v627_v0  ;;  %v831_v4 = vld [vmem:[#allocation10 + $0x8] sm:$0xff]  ;;  %v832_v7 = vld [vmem:[#allocation10 + $0x10] sm:$0xff]  ;;  %s3940_s20 = smov 80   ;;  %s4588_s3 = scalar_lea.vmem [#allocation22], %s3293_s18  ;;  %vm1408_vm1 = vcmask 261120  }
 0x18f   : > { %v619_v5 = vld [vmem:[%s4415_s13] sm:$0xff]  ;;  %v3091_v6 = vpack.c.bf16 %v831_v4, %v830_v2  ;;  %v833_v8 = vld [vmem:[#allocation10 + $0x18] sm:$0xff]  ;;  %v834_v10 = vld [vmem:[#allocation10 + $0x20] sm:$0xff]  ;;  %s3294_s6 = smul.u32 5120, %s4030_s27  ;;  %s2282_s17 = sshll.u32 %s4588_s3, 4  ;;  %s4735_s17 = int_to_ptr.vmem [resolvable:$true] %s2282_s17 }
 0x190   : > { %2759 = vmatprep.mubr.msk.f32.mxu0 %vm636_vm0, %v619_v5  ;;  %3088 = vmatprep.subr.bf16.mxu0 %v3087_v3  ;;  %v3095_v9 = vpack.c.bf16 %v833_v8, %v832_v7  ;;  %v835_v11 = vld [vmem:[#allocation10 + $0x28] sm:$0xff]  ;;  %v620_v12 = vld [vmem:[%s4415_s13 + $0x8] sm:$0xff]  ;;  %v621_v13 = vld [vmem:[%s4415_s13 + $0x10] sm:$0xff]  ;;  %s4848_s8 = sld [smem:[#allocation42_spill]]  ;;  %s2268_s27 = scalar_lea.sflag [#allocation4], %s4401_s30 }
 0x191   : > { %3090 = vmatpush3.bf16.msra.mxu0 %v3087_v3  ;;  %3092 = vmatprep.subr.bf16.mxu1 %v3091_v6  ;;  %v3099_v14 = vpack.c.bf16 %v835_v11, %v834_v10  ;;  %v836_v15 = vld [vmem:[#allocation10 + $0x30] sm:$0xff]  ;;  %v837_v16 = vld [vmem:[#allocation10 + $0x38] sm:$0xff]  ;;  %v622_v17 = vld [vmem:[%s4415_s13 + $0x18] sm:$0xff]  ;;  %s3827_s19 = scalar_lea.vmem %s4735_s17, 5120  ;;  %p4849_p7 = scmp.ne.s32.totalorder %s4826_s16, 0 }
 0x192   : > { %3094 = vmatpush3.bf16.msra.mxu1 %v3091_v6  ;;  %v822_v18 = vld [vmem:[%s4407_s28] sm:$0xff]  ;;  %v3103_v20 = vpack.c.bf16 %v837_v16, %v836_v15  ;;  %v838_v21 = vld [vmem:[#allocation10 + $0x40] sm:$0xff]  ;;  %v624_v23 = vld [vmem:[%s4415_s13 + $0x28] sm:$0xff]  ;;  %p3828_p8 = scmp.ne.s32.totalorder %s4735_s17, %s3827_s19  ;;  %s3941_s18 = smov [#allocation22]  }
 0x193   : > { %3096 = vmatprep.subr.bf16.mxu1 %v3095_v9  ;;  %v623_v19 = vld [vmem:[%s4415_s13 + $0x20] sm:$0xff]  ;;  %2803 = vmatprep.mubr.f32.mxu1 %v822_v18  ;;  %v625_v24 = vld [vmem:[%s4415_s13 + $0x30] sm:$0xff]  ;;  %v626_v28 = vld [vmem:[%s4415_s13 + $0x38] sm:$0xff]  ;;  %s3831_s15 = sshll.u32 %s3941_s18, 4  ;;  %s3832_s15 = int_to_ptr.vmem [resolvable:$false] %s3831_s15 }
 0x194   : > { %2760 = vmatmul.mubr.msk.f32.vlgmr.msra.gmra.mrb[0].mxu0 %vm636_vm0, %v620_v12  ;;  %v839_v22 = vld [vmem:[#allocation10 + $0x48] sm:$0xff]  ;;  %v840_v26 = vld [vmem:[#allocation10 + $0x50] sm:$0xff]  ;;  %v841_v27 = vld [vmem:[#allocation10 + $0x58] sm:$0xff]  ;;  %p3829_p11 = pnand %p3828_p8, %p4849_p7  ;;  %p3834_p12 = scmp.lt.s32.totalorder %s4735_s17, %s3832_s15 }
 0x195   : > { %2762 = vmatprep.mubr.msk.f32.mxu0 %vm636_vm0, %v621_v13  ;;  %v3107_v25 = vpack.c.bf16 %v839_v22, %v838_v21  ;;  %v3111_v29 = vpack.c.bf16 %v841_v27, %v840_v26  ;;  %v842_v30 = vld [vmem:[#allocation10 + $0x60] sm:$0xff]  ;;  %v843_v31 = vld [vmem:[#allocation10 + $0x68] sm:$0xff]  ;;  %v844_v33 = vld [vmem:[#allocation10 + $0x70] sm:$0xff] }
 0x196   : > { %3098 = vmatpush3.bf16.msra.mxu1 %v3095_v9  ;;  %v3115_v32 = vpack.c.bf16 %v843_v31, %v842_v30  ;;  %v845_v34 = vld [vmem:[#allocation10 + $0x78] sm:$0xff]  ;;  %v1114_v36 = vld [vmem:[#allocation13] sm:$0xff]  ;;  %v1116_v39 = vld [vmem:[#allocation13 + $0x10] sm:$0xff]  ;;  %s4733_s0 = scalar_lea.hbm %s4848_s8, %s3294_s6  ;;  %p3830_p3 = pneg %p3829_p11 }
 0x197   : > { %3100 = vmatprep.subr.bf16.mxu1 %v3099_v14  ;;  %v3119_v35 = vpack.c.bf16 %v845_v34, %v844_v33  ;;  %v1115_v37 = vld [vmem:[#allocation13 + $0x8] sm:$0xff]  ;;  %v1117_v40 = vld [vmem:[#allocation13 + $0x18] sm:$0xff]  ;;  %v1118_v44 = vld [vmem:[#allocation13 + $0x20] sm:$0xff] }
 0x198   : > { %2763 = vmatmul.mubr.msk.f32.gmra.mrb[2].mxu0 %vm636_vm0, %v622_v17  ;;  %v4462_v38 = vpack.c.bf16 %v1115_v37, %v1114_v36  ;;  %v823_v41 = vld [vmem:[%s4407_s28 + $0x28] sm:$0xff]  ;;  %v824_v42 = vld [vmem:[%s4407_s28 + $0x50] sm:$0xff]  ;;  %v4467_v43 = vpack.c.bf16 %v1117_v40, %v1116_v39  ;;  %v825_v46 = vld [vmem:[%s4407_s28 + $0x78] sm:$0xff] }
 0x199   : > { %2765 = vmatprep.mubr.msk.f32.mxu0 %vm636_vm0, %v623_v19  ;;  %v1119_v45 = vld [vmem:[#allocation13 + $0x28] sm:$0xff]  ;;  %v826_v47 = vld [vmem:[%s4407_s28 + $0xa0] sm:$0xff]  ;;  %v1120_v49 = vld [vmem:[#allocation13 + $0x30] sm:$0xff] }
 0x19a   : > { %3102 = vmatpush3.bf16.msra.mxu1 %v3099_v14  ;;  %v4473_v48 = vpack.c.bf16 %v1119_v45, %v1118_v44  ;;  %v1121_v50 = vld [vmem:[#allocation13 + $0x38] sm:$0xff]  ;;  %v827_v51 = vld [vmem:[%s4407_s28 + $0xc8] sm:$0xff]  ;;  %v828_v52 = vld [vmem:[%s4407_s28 + $0xf0] sm:$0xff] }
 0x19b   : > { %3104 = vmatprep.subr.bf16.mxu1 %v3103_v20  ;;  %v4479_v53 = vpack.c.bf16 %v1121_v50, %v1120_v49  ;;  %v1122_v54 = vld [vmem:[#allocation13 + $0x40] sm:$0xff]  ;;  %v1123_v55 = vld [vmem:[#allocation13 + $0x48] sm:$0xff]  ;;  %v829_v56 = vld [vmem:[%s4407_s28 + $0x118] sm:$0xff] }
 0x19c   : > { %2766 = vmatmul.mubr.msk.f32.gmra.mrb[4].mxu0 %vm636_vm0, %v624_v23  ;;  %v4484_v57 = vpack.c.bf16 %v1123_v55, %v1122_v54  ;;  %v1106_v58 = vld [vmem:[%s4407_s28 + $0x10] sm:$0xff]  ;;  %v1125_v60 = vld [vmem:[#allocation13 + $0x58] sm:$0xff]  ;;  %v1126_v62 = vld [vmem:[#allocation13 + $0x60] sm:$0xff] }
 0x19d   : > { %2768 = vmatprep.mubr.msk.f32.mxu0 %vm636_vm0, %v625_v24  ;;  %v1124_v59 = vld [vmem:[#allocation13 + $0x50] sm:$0xff]  ;;  %v1127_v63 = vld [vmem:[#allocation13 + $0x68] sm:$0xff]  ;;  %v1129_v2 = vld [vmem:[#allocation13 + $0x78] sm:$0xff] }
 0x19e   : > { %3106 = vmatpush3.bf16.msra.mxu1 %v3103_v20  ;;  %v4489_v61 = vpack.c.bf16 %v1125_v60, %v1124_v59  ;;  %v4493_v0 = vpack.c.bf16 %v1127_v63, %v1126_v62  ;;  %v1128_v1 = vld [vmem:[#allocation13 + $0x70] sm:$0xff]  ;;  %v1108_v5 = vld [vmem:[%s4407_s28 + $0x60] sm:$0xff]  ;;  %v1109_v6 = vld [vmem:[%s4407_s28 + $0x88] sm:$0xff] }
 0x19f   : > { %3108 = vmatprep.subr.bf16.mxu1 %v3107_v25  ;;  %v4497_v3 = vpack.c.bf16 %v1129_v2, %v1128_v1  ;;  %v1107_v4 = vld [vmem:[%s4407_s28 + $0x38] sm:$0xff]  ;;  %v1110_v7 = vld [vmem:[%s4407_s28 + $0xb0] sm:$0xff]  ;;  %v1112_v9 = vld [vmem:[%s4407_s28 + $0x100] sm:$0xff] }
 0x1a0   : > { %2769 = vmatmul.mubr.msk.f32.gmra.mrb[6].mxu0 %vm636_vm0, %v626_v28  ;;  %v1111_v8 = vld [vmem:[%s4407_s28 + $0xd8] sm:$0xff]  ;;  %v1113_v10 = vld [vmem:[%s4407_s28 + $0x128] sm:$0xff]  ;;  %v2504_v14 = vld [vmem:[#allocation8] ss:$0 sm:$0xff] }
 0x1a1   : > { %v959_v11 = vld [vmem:[#allocation11] sm:$0xff]  ;;  %v960_v12 = vld [vmem:[#allocation11 + $0x8] sm:$0xff] }
 0x1a2   : > { %3110 = vmatpush3.bf16.msra.mxu1 %v3107_v25  ;;  %v3123_v13 = vpack.c.bf16 %v960_v12, %v959_v11 }
 0x1a3   : > { %3112 = vmatprep.subr.bf16.mxu1 %v3111_v29 }
 0x1a4   : > { %3124 = vmatprep.subr.bf16.mxu0 %v3123_v13 }
 0x1a5   : > { %3126 = vmatpush3.bf16.msra.mxu0 %v3123_v13 }
 0x1a6   : > { %3114 = vmatpush3.bf16.msra.mxu1 %v3111_v29  ;;  %3128 = vmatprep.subr.bf16.mxu0 %v4462_v38 }
 0x1a7   : > { %3116 = vmatprep.subr.bf16.mxu1 %v3115_v32 }
 0x1aa   : > { %3118 = vmatpush3.bf16.msra.mxu1 %v3115_v32 }
 0x1ab   : > { %3120 = vmatprep.subr.bf16.mxu1 %v3119_v35 }
 0x1ae   : > { %3122 = vmatpush3.bf16.msra.mxu1 %v3119_v35 }
 0x1af   : > { %3160 = vmatprep.subr.bf16.mxu1 %v4462_v38 }
 0x1b1   : > { %2804 = vmatmul.mubr.f32.vlgmr.msra.gmra.mrb[0].mxu1 %v823_v41 }
 0x1b2   : > { %2806 = vmatprep.mubr.f32.mxu1 %v824_v42  ;;  %3162 = vmatpush3.bf16.msra.mxu1 %v4462_v38 }
 0x1b3   : > { %3164 = vmatprep.subr.bf16.mxu1 %v4467_v43 }
 0x1b5   : > { %2807 = vmatmul.mubr.f32.gmra.mrb[2].mxu1 %v825_v46 }
 0x1b6   : > { %2809 = vmatprep.mubr.f32.mxu1 %v826_v47  ;;  %3166 = vmatpush3.bf16.msra.mxu1 %v4467_v43 }
 0x1b7   : > { %3168 = vmatprep.subr.bf16.mxu1 %v4473_v48 }
 0x1b9   : > { %2810 = vmatmul.mubr.f32.gmra.mrb[4].mxu1 %v827_v51 }
 0x1ba   : > { %2812 = vmatprep.mubr.f32.mxu1 %v828_v52  ;;  %3170 = vmatpush3.bf16.msra.mxu1 %v4473_v48 }
 0x1bb   : > { %3172 = vmatprep.subr.bf16.mxu1 %v4479_v53 }
 0x1bd   : > { %2813 = vmatmul.mubr.f32.gmra.mrb[6].mxu1 %v829_v56 }
 0x1be   : > { %3174 = vmatpush3.bf16.msra.mxu1 %v4479_v53  ;;  %2907 = vmatprep.mubr.f32.mxu1 %v1106_v58 }
 0x1bf   : > { %3176 = vmatprep.subr.bf16.mxu1 %v4484_v57 }
 0x1c2   : > { %3178 = vmatpush3.bf16.msra.mxu1 %v4484_v57 }
 0x1c3   : > { %3180 = vmatprep.subr.bf16.mxu1 %v4489_v61 }
 0x1c6   : > { %3182 = vmatpush3.bf16.msra.mxu1 %v4489_v61 }
 0x1c7   : > { %3184 = vmatprep.subr.bf16.mxu1 %v4493_v0 }
 0x1ca   : > { %3186 = vmatpush3.bf16.msra.mxu1 %v4493_v0 }
 0x1cb   : > { %3188 = vmatprep.subr.bf16.mxu1 %v4497_v3 }
 0x1ce   : > { %3190 = vmatpush3.bf16.msra.mxu1 %v4497_v3 }
 0x1d1   : > { %2908 = vmatmul.mubr.f32.vlgmr.msra.gmra.mrb[8].mxu1 %v1107_v4 }
 0x1d2   : > { %2910 = vmatprep.mubr.f32.mxu1 %v1108_v5 }
 0x1d5   : > { %2911 = vmatmul.mubr.f32.gmra.mrb[10].mxu1 %v1109_v6 }
 0x1d6   : > { %2913 = vmatprep.mubr.f32.mxu1 %v1110_v7 }
 0x1d9   : > { %2914 = vmatmul.mubr.f32.gmra.mrb[12].mxu1 %v1111_v8 }
 0x1da   : > { %2916 = vmatprep.mubr.f32.mxu1 %v1112_v9 }
 0x1dd   : > { %2917 = vmatmul.mubr.f32.gmra.mrb[14].mxu1 %v1113_v10 }
 0x267   : > { %v2761_v15 = vpop.f32.mrb[0].mxu0 }
 0x268   : > { %v733_v16 = vadd.f32 %v2761_v15, %v2504_v14  ;;  %v727_v17 = vpop.f32.mrb[1].mxu0 }
 0x269   : > { %v728_v18 = vadd.f32 %v2504_v14, %v727_v17 }
 0x26a   : > { %v2514_v19 = vmul.f32 -1.442695, %v733_v16 }
 0x26b   : > { %v2513_v20 = vmul.f32 -1.442695, %v728_v18  ;;  %v2764_v21 = vpop.f32.mrb[2].mxu0 }
 0x26c   : > { %3455 = vpow2.f32 %v2514_v19  ;;  %v743_v22 = vadd.f32 %v2764_v21, %v2504_v14  ;;  %v737_v23 = vpop.f32.mrb[3].mxu0 }
 0x26d   : > { %3457 = vpow2.f32 %v2513_v20  ;;  %v738_v24 = vadd.f32 %v2504_v14, %v737_v23 }
 0x26e   : > { %v2516_v25 = vmul.f32 -1.442695, %v743_v22 }
 0x26f   : > { %v2515_v26 = vmul.f32 -1.442695, %v738_v24  ;;  %v2767_v27 = vpop.f32.mrb[4].mxu0 }
 0x270   : > { %3459 = vpow2.f32 %v2516_v25  ;;  %v4510_v28 = vadd.f32 %v2767_v27, %v2504_v14  ;;  %v747_v29 = vpop.f32.mrb[5].mxu0 }
 0x271   : > { %3461 = vpow2.f32 %v2515_v26  ;;  %v4512_v30 = vadd.f32 %v2504_v14, %v747_v29  ;;  %v1098_v29 = vld [vmem:[%s4407_s28 + $0x8] sm:$0xff] }
 0x272   : > { %v2518_v31 = vmul.f32 -1.442695, %v4510_v28 }
 0x273   : > { %v2517_v32 = vmul.f32 -1.442695, %v4512_v30  ;;  %v2770_v33 = vpop.f32.mrb[6].mxu0 }
 0x274   : > { %3463 = vpow2.f32 %v2518_v31  ;;  %v4516_v34 = vadd.f32 %v2770_v33, %v2504_v14  ;;  %v757_v35 = vpop.f32.mrb[7].mxu0 }
 0x275   : > { %3465 = vpow2.f32 %v2517_v32  ;;  %v4518_v36 = vadd.f32 %v2504_v14, %v757_v35  ;;  %v1102_v32 = vld [vmem:[%s4407_s28 + $0xa8] sm:$0xff]  ;;  %v1103_v35 = vld [vmem:[%s4407_s28 + $0xd0] sm:$0xff] }
 0x276   : > { %v3456_v37 = vpop.eup %3455  ;;  %v2520_v39 = vmul.f32 -1.442695, %v4516_v34 }
 0x277   : > { %v3458_v40 = vpop.eup %3457  ;;  %v791_v41 = vadd.f32 1.0, %v3456_v37  ;;  %v2519_v42 = vmul.f32 -1.442695, %v4518_v36 }
 0x278   : > { %v790_v44 = vadd.f32 1.0, %v3458_v40  ;;  %3467 = vpow2.f32 %v2520_v39  ;;  %v1105_v39 = vld [vmem:[%s4407_s28 + $0x120] sm:$0xff] }
 0x279   : > { %3469 = vrcp.f32 %v791_v41  ;;  %v1404_v40 = vld [vmem:[#allocation14] sm:$0xff]  ;;  %v1405_v41 = vld [vmem:[#allocation14 + $0x8] sm:$0xff] }
 0x27a   : > { %v3460_v45 = vpop.eup %3459  ;;  %3471 = vrcp.f32 %v790_v44  ;;  %v3191_v44 = vpack.c.bf16 %v1405_v41, %v1404_v40  ;;  %v1710_v40 = vld [vmem:[#allocation17 + $0x38] sm:$0xff] }
 0x27b   : > { %v3462_v46 = vpop.eup %3461  ;;  %v793_v47 = vadd.f32 1.0, %v3460_v45  ;;  %3473 = vpow2.f32 %v2519_v42  ;;  %v1546_v42 = vld [vmem:[#allocation16] sm:$0xff]  ;;  %v1547_v45 = vld [vmem:[#allocation16 + $0x8] sm:$0xff] }
 0x27c   : > { %v792_v49 = vadd.f32 1.0, %v3462_v46  ;;  %v1406_v46 = vld [vmem:[#allocation14 + $0x10] sm:$0xff] }
 0x27d   : > { %3475 = vrcp.f32 %v793_v47  ;;  %v1407_v47 = vld [vmem:[#allocation14 + $0x18] sm:$0xff] }
 0x27e   : > { %v3464_v50 = vpop.eup %3463  ;;  %3477 = vrcp.f32 %v792_v49  ;;  %v3199_v49 = vpack.c.bf16 %v1547_v45, %v1546_v42 }
 0x27f   : > { %v3466_v51 = vpop.eup %3465  ;;  %v795_v52 = vadd.f32 1.0, %v3464_v50  ;;  %v3195_v50 = vpack.c.bf16 %v1407_v47, %v1406_v46 }
 0x280   : > { %v794_v54 = vadd.f32 1.0, %v3466_v51  ;;  %v1548_v51 = vld [vmem:[#allocation16 + $0x10] sm:$0xff]  ;;  %3200 = vmatprep.subr.bf16.mxu1 %v3199_v49 }
 0x281   : > { %3479 = vrcp.f32 %v795_v52  ;;  %v1549_v52 = vld [vmem:[#allocation16 + $0x18] sm:$0xff]  ;;  %3202 = vmatpush3.bf16.msra.mxu1 %v3199_v49 }
 0x282   : > { %v3468_v55 = vpop.eup %3467  ;;  %3481 = vrcp.f32 %v794_v54  ;;  %v3203_v54 = vpack.c.bf16 %v1549_v52, %v1548_v51 }
 0x283   : > { %v3470_v56 = vpop.eup %3469  ;;  %v797_v58 = vadd.f32 1.0, %v3468_v55  ;;  %v1703_v55 = vld [vmem:[#allocation17] sm:$0xff] }
 0x284   : > { %v3472_v59 = vpop.eup %3471  ;;  %v4522_v60 = vmul.f32 %v3470_v56, %v733_v16  ;;  %v2805_v62 = vpop.f32.mrb[0].mxu1  ;;  %3204 = vmatprep.subr.bf16.mxu1 %v3203_v54  ;;  %v1704_v56 = vld [vmem:[#allocation17 + $0x8] sm:$0xff] }
 0x285   : > { %v3474_v63 = vpop.eup %3473  ;;  %v814_v1 = vmul.f32 %v3472_v59, %v728_v18  ;;  %3483 = vrcp.f32 %v797_v58  ;;  %v912_v2 = vpop.f32.mrb[1].mxu1  ;;  %3206 = vmatpush3.bf16.msra.mxu1 %v3203_v54  ;;  %v3207_v58 = vpack.c.bf16 %v1704_v56, %v1703_v55  ;;  %v1711_v55 = vld [vmem:[#allocation17 + $0x40] sm:$0xff]  ;;  %v1712_v56 = vld [vmem:[#allocation17 + $0x48] sm:$0xff] }
 0x286   : > { %v796_v4 = vadd.f32 1.0, %v3474_v63  ;;  %v952_v5 = vmul.f32 %v2805_v62, %v4522_v60 }
 0x287   : > { %v3476_v6 = vpop.eup %3475  ;;  %v951_v7 = vmul.f32 %v912_v2, %v814_v1  ;;  %1243 = vrot.lane.b32.xlu0 %v814_v1, %s3939_s14  ;;  %3240 = vmatprep.subr.bf16.mxu1 %v3207_v58 }
 0x288   : > { %v3478_v8 = vpop.eup %3477  ;;  %v817_v9 = vmul.f32 %v3476_v6, %v743_v22  ;;  %3485 = vrcp.f32 %v796_v4  ;;  %v2808_v10 = vpop.f32.mrb[2].mxu1 }
 0x289   : > { %v816_v11 = vmul.f32 %v3478_v8, %v738_v24  ;;  %2819 = vmatprep.mubr.msk.f32.mxu0 %vm636_vm0, %v951_v7  ;;  %v922_v12 = vpop.f32.mrb[3].mxu1 }
 0x28a   : > { %v954_v13 = vmul.f32 %v2808_v10, %v817_v9  ;;  %2820 = vmatmul.mubr.msk.f32.vlgmr.msra.gmra.mrb[8].mxu0 %vm636_vm0, %v952_v5 }
 0x28b   : > { %v3480_v14 = vpop.eup %3479  ;;  %v953_v15 = vmul.f32 %v922_v12, %v816_v11  ;;  %3130 = vmatpush3.bf16.msra.mxu0 %v4462_v38  ;;  %1247 = vrot.lane.b32.xlu1 %v816_v11, %s3939_s14 }
 0x28c   : > { %v3482_v16 = vpop.eup %3481  ;;  %v819_v17 = vmul.f32 %v3480_v14, %v4510_v28  ;;  %1245 = vrot.lane.b32.xlu0 %v4522_v60, %s3939_s14  ;;  %v2811_v18 = vpop.f32.mrb[4].mxu1  ;;  %3132 = vmatprep.subr.bf16.mxu0 %v4467_v43  ;;  %v1705_v14 = vld [vmem:[#allocation17 + $0x10] sm:$0xff] }
 0x28d   : > { %v818_v19 = vmul.f32 %v3482_v16, %v4512_v30  ;;  %2822 = vmatprep.mubr.msk.f32.mxu0 %vm636_vm0, %v953_v15  ;;  %v932_v20 = vpop.f32.mrb[5].mxu1  ;;  %v1706_v15 = vld [vmem:[#allocation17 + $0x18] sm:$0xff] }
 0x28e   : > { %v956_v21 = vmul.f32 %v2811_v18, %v819_v17  ;;  %2823 = vmatmul.mubr.msk.f32.gmra.mrb[10].mxu0 %vm636_vm0, %v954_v13 }
 0x28f   : > { %v3484_v38 = vpop.eup %3483  ;;  %v955_v22 = vmul.f32 %v932_v20, %v818_v19  ;;  %3134 = vmatpush3.bf16.msra.mxu0 %v4467_v43  ;;  %1249 = vrot.lane.b32.xlu1 %v817_v9, %s3939_s14 }
 0x290   : > { %v821_v23 = vmul.f32 %v3484_v38, %v4516_v34  ;;  %1251 = vrot.lane.b32.xlu0 %v818_v19, %s3939_s14  ;;  %v2814_v24 = vpop.f32.mrb[6].mxu1  ;;  %3136 = vmatprep.subr.bf16.mxu0 %v4473_v48 }
 0x291   : > { %2825 = vmatprep.mubr.msk.f32.mxu0 %vm636_vm0, %v955_v22  ;;  %v942_v25 = vpop.f32.mrb[7].mxu1 }
 0x292   : > { %v3486_v26 = vpop.eup %3485  ;;  %v958_v27 = vmul.f32 %v2814_v24, %v821_v23  ;;  %2826 = vmatmul.mubr.msk.f32.gmra.mrb[12].mxu0 %vm636_vm0, %v956_v21 }
 0x293   : > { %v820_v28 = vmul.f32 %v3486_v26, %v4518_v36  ;;  %3138 = vmatpush3.bf16.msra.mxu0 %v4473_v48  ;;  %1253 = vrot.lane.b32.xlu1 %v819_v17, %s3939_s14 }
 0x294   : > { %3140 = vmatprep.subr.bf16.mxu0 %v4479_v53 }
 0x295   : > { %v957_v43 = vmul.f32 %v942_v25, %v820_v28  ;;  %1255 = vrot.lane.b32.xlu0 %v820_v28, %s3939_s14 }
 0x297   : > { %2828 = vmatprep.mubr.msk.f32.mxu0 %vm636_vm0, %v957_v43  ;;  %3142 = vmatpush3.bf16.msra.mxu0 %v4479_v53  ;;  %v1708_v43 = vld [vmem:[#allocation17 + $0x28] sm:$0xff] }
 0x298   : > { %2829 = vmatmul.mubr.msk.f32.gmra.mrb[14].mxu0 %vm636_vm0, %v958_v27  ;;  %1257 = vrot.lane.b32.xlu1 %v821_v23, %s3939_s14 }
 0x299   : > { %1824 = vrot.lane.b32.xlu0 %v814_v1, %s3940_s20  ;;  %3144 = vmatprep.subr.bf16.mxu0 %v4484_v57 }
 0x29a   : > { %2863 = vmatprep.mubr.f32.mxu0 %v1098_v29 }
 0x29b   : > { %3146 = vmatpush3.bf16.msra.mxu0 %v4484_v57  ;;  %v1099_v57 = vld [vmem:[%s4407_s28 + $0x30] sm:$0xff] }
 0x29c   : > { %1826 = vrot.lane.b32.xlu1 %v4522_v60, %s3940_s20  ;;  %3148 = vmatprep.subr.bf16.mxu0 %v4489_v61 }
 0x29d   : > { %1828 = vrot.lane.b32.xlu0 %v816_v11, %s3940_s20 }
 0x29f   : > { %3150 = vmatpush3.bf16.msra.mxu0 %v4489_v61  ;;  %v1100_v61 = vld [vmem:[%s4407_s28 + $0x58] sm:$0xff] }
 0x2a0   : > { %1830 = vrot.lane.b32.xlu1 %v817_v9, %s3940_s20  ;;  %3152 = vmatprep.subr.bf16.mxu0 %v4493_v0 }
 0x2a1   : > { %1832 = vrot.lane.b32.xlu0 %v818_v19, %s3940_s20 }
 0x2a3   : > { %3154 = vmatpush3.bf16.msra.mxu0 %v4493_v0  ;;  %v1101_v0 = vld [vmem:[%s4407_s28 + $0x80] sm:$0xff] }
 0x2a4   : > { %1834 = vrot.lane.b32.xlu1 %v819_v17, %s3940_s20  ;;  %3156 = vmatprep.subr.bf16.mxu0 %v4497_v3  ;;  %v4562_v48 = vpop.f32.mrb[8].mxu1 }
 0x2a5   : > { %1836 = vrot.lane.b32.xlu0 %v820_v28, %s3940_s20  ;;  %v4564_v53 = vpop.f32.mrb[9].mxu1  ;;  %v1707_v28 = vld [vmem:[#allocation17 + $0x20] sm:$0xff] }
 0x2a7   : > { %3158 = vmatpush3.bf16.msra.mxu0 %v4497_v3  ;;  %v1104_v3 = vld [vmem:[%s4407_s28 + $0xf8] sm:$0xff] }
 0x2a8   : > { %1838 = vrot.lane.b32.xlu1 %v821_v23, %s3940_s20  ;;  %v4569_v30 = vpop.f32.mrb[10].mxu1  ;;  %3192 = vmatprep.subr.bf16.mxu0 %v3191_v44  ;;  %v3211_v23 = vpack.c.bf16 %v1706_v15, %v1705_v14  ;;  %v1696_v14 = vld [vmem:[%s4407_s28 + $0x48] sm:$0xff] }
 0x2a9   : > { %v4571_v31 = vpop.f32.mrb[11].mxu1  ;;  %v1689_v15 = vld [vmem:[%s4407_s28 + $0x68] sm:$0xff] }
 0x2aa   : > { %2864 = vmatmul.mubr.f32.vlgmr.msra.gmra.mrb[16].mxu0 %v1099_v57 }
 0x2ab   : > { %2866 = vmatprep.mubr.f32.mxu0 %v1100_v61  ;;  %3194 = vmatpush3.bf16.msra.mxu0 %v3191_v44 }
 0x2ac   : > { %v4575_v33 = vpop.f32.mrb[12].mxu1  ;;  %3196 = vmatprep.subr.bf16.mxu0 %v3195_v50 }
 0x2ad   : > { %v4577_v34 = vpop.f32.mrb[13].mxu1 }
 0x2ae   : > { %2867 = vmatmul.mubr.f32.gmra.mrb[18].mxu0 %v1101_v0 }
 0x2af   : > { %2869 = vmatprep.mubr.f32.mxu0 %v1102_v32  ;;  %3198 = vmatpush3.bf16.msra.mxu0 %v3195_v50  ;;  %v3215_v32 = vpack.c.bf16 %v1708_v43, %v1707_v28  ;;  %v1987_v28 = vld [vmem:[#allocation19 + $0x10] sm:$0xff] }
 0x2b0   : > { %v4581_v36 = vpop.f32.mrb[14].mxu1  ;;  %3208 = vmatprep.subr.bf16.mxu0 %v3207_v58 }
 0x2b1   : > { %v4583_v37 = vpop.f32.mrb[15].mxu1 }
 0x2b2   : > { %2870 = vmatmul.mubr.f32.gmra.mrb[20].mxu0 %v1103_v35 }
 0x2b3   : > { %2872 = vmatprep.mubr.f32.mxu0 %v1104_v3 }
 0x2b6   : > { %2873 = vmatmul.mubr.f32.gmra.mrb[22].mxu0 %v1105_v39  ;;  %v1709_v39 = vld [vmem:[#allocation17 + $0x30] sm:$0xff] }
 0x2f9   : > { %v1244_v6 = vpop.permute.xlu0 %1243 }
 0x2fa   : > { %v1380_v16 = vmul.f32 %v4564_v53, %v1244_v6 }
 0x2fd   : > { %v1248_v7 = vpop.permute.xlu1 %1247 }
 0x2fe   : > { %v1246_v8 = vpop.permute.xlu0 %1245  ;;  %v1382_v29 = vmul.f32 %v4571_v31, %v1248_v7 }
 0x2ff   : > { %v1381_v11 = vmul.f32 %v4562_v48, %v1246_v8 }
 0x301   : > { %v1250_v9 = vpop.permute.xlu1 %1249 }
 0x302   : > { %v1383_v24 = vmul.f32 %v4569_v30, %v1250_v9  ;;  %v1252_v25 = vpop.permute.xlu0 %1251 }
 0x303   : > { %v1384_v41 = vmul.f32 %v4577_v34, %v1252_v25  ;;  %v3219_v34 = vpack.c.bf16 %v1710_v40, %v1709_v39 }
 0x305   : > { %v1254_v20 = vpop.permute.xlu1 %1253 }
 0x306   : > { %v1385_v31 = vmul.f32 %v4575_v33, %v1254_v20 }
 0x307   : > { %v1256_v45 = vpop.permute.xlu0 %1255 }
 0x30a   : > { %v1258_v42 = vpop.permute.xlu1 %1257 }
 0x30b   : > { %v1387_v51 = vmul.f32 %v4581_v36, %v1258_v42 }
 0x35d   : > { %v2821_v59 = vpop.f32.mrb[8].mxu0 }
 0x35e   : > { %1091 = vst [vmem:[%s4588_s3 + $0x28] sm:$0xff] %v2821_v59  ;;  %v1051_v60 = vpop.f32.mrb[9].mxu0 }
 0x35f   : > { %1090 = vst [vmem:[%s4588_s3] sm:$0xff] %v1051_v60 }
 0x361   : > { %v2824_v62 = vpop.f32.mrb[10].mxu0 }
 0x362   : > { %1093 = vst [vmem:[%s4588_s3 + $0x78] sm:$0xff] %v2824_v62  ;;  %v1061_v63 = vpop.f32.mrb[11].mxu0 }
 0x363   : > { %1092 = vst [vmem:[%s4588_s3 + $0x50] sm:$0xff] %v1061_v63 }
 0x365   : > { %v2827_v1 = vpop.f32.mrb[12].mxu0 }
 0x366   : > { %1095 = vst [vmem:[%s4588_s3 + $0xc8] sm:$0xff] %v2827_v1  ;;  %v1071_v2 = vpop.f32.mrb[13].mxu0  ;;  %v1713_v1 = vld [vmem:[#allocation17 + $0x50] sm:$0xff] }
 0x367   : > { %1094 = vst [vmem:[%s4588_s3 + $0xa0] sm:$0xff] %v1071_v2  ;;  %v1714_v2 = vld [vmem:[#allocation17 + $0x58] sm:$0xff] }
 0x36b   : > { %v2830_v4 = vpop.f32.mrb[14].mxu0 }
 0x36c   : > { %1097 = vst [vmem:[%s4588_s3 + $0x118] sm:$0xff] %v2830_v4  ;;  %v1081_v5 = vpop.f32.mrb[15].mxu0  ;;  %v1687_v4 = vld [vmem:[%s4407_s28 + $0x18] sm:$0xff] }
 0x36d   : > { %1096 = vst [vmem:[%s4588_s3 + $0xf0] sm:$0xff] %v1081_v5  ;;  %v1695_v5 = vld [vmem:[%s4407_s28 + $0x20] sm:$0xff] }
 0x37d   : > { %v2865_v10 = vpop.f32.mrb[16].mxu0 }
 0x37e   : > { %v1268_v12 = vmul.f32 %v2865_v10, %v1246_v8  ;;  %v1196_v13 = vpop.f32.mrb[17].mxu0  ;;  %v1716_v8 = vld [vmem:[#allocation17 + $0x68] sm:$0xff]  ;;  %v1717_v10 = vld [vmem:[#allocation17 + $0x70] sm:$0xff] }
 0x37f   : > { %v1267_v17 = vmul.f32 %v1244_v6, %v1196_v13  ;;  %v3227_v6 = vpack.c.bf16 %v1714_v2, %v1713_v1  ;;  %v1688_v13 = vld [vmem:[%s4407_s28 + $0x40] sm:$0xff] }
 0x380   : > { %v1389_v18 = vsel %vm636_vm0, %v1268_v12, %v1381_v11  ;;  %v1397_v19 = vsel %vm636_vm0, %v1381_v11, %v1268_v12  ;;  %v1718_v11 = vld [vmem:[#allocation17 + $0x78] sm:$0xff] }
 0x381   : > { %v2868_v21 = vpop.f32.mrb[18].mxu0  ;;  %v1388_v38 = vsel %vm636_vm0, %v1267_v17, %v1380_v16  ;;  %v1396_v22 = vsel %vm636_vm0, %v1380_v16, %v1267_v17  ;;  %v3235_v12 = vpack.c.bf16 %v1718_v11, %v1717_v10  ;;  %v1697_v16 = vld [vmem:[%s4407_s28 + $0x70] sm:$0xff] }
 0x382   : > { %v1270_v26 = vmul.f32 %v2868_v21, %v1250_v9  ;;  %v1206_v27 = vpop.f32.mrb[19].mxu0  ;;  %2927 = vmatprep.mubr.msk.f32.mxu0 %vm1408_vm1, %v1388_v38  ;;  %2947 = vmatprep.mubr.msk.f32.mxu1 %vm1408_vm1, %v1396_v22  ;;  %v1690_v17 = vld [vmem:[%s4407_s28 + $0x90] sm:$0xff]  ;;  %v1692_v21 = vld [vmem:[%s4407_s28 + $0xe0] sm:$0xff]  ;;  %v1700_v38 = vld [vmem:[%s4407_s28 + $0xe8] sm:$0xff] }
 0x383   : > { %v1269_v48 = vmul.f32 %v1248_v7, %v1206_v27  ;;  %2928 = vmatmul.mubr.msk.f32.vlgmr.msra.gmra.mrb[24].mxu0 %vm1408_vm1, %v1389_v18  ;;  %2948 = vmatmul.mubr.msk.f32.vlgmr.msra.gmra.mrb[16].mxu1 %vm1408_vm1, %v1397_v19  ;;  %v1715_v7 = vld [vmem:[#allocation17 + $0x60] sm:$0xff]  ;;  %v1698_v18 = vld [vmem:[%s4407_s28 + $0x98] sm:$0xff]  ;;  %v1986_v27 = vld [vmem:[#allocation19 + $0x8] sm:$0xff] }
 0x384   : > { %3210 = vmatpush3.bf16.msra.mxu0 %v3207_v58  ;;  %3242 = vmatpush3.bf16.msra.mxu1 %v3207_v58  ;;  %v1391_v53 = vsel %vm636_vm0, %v1270_v26, %v1383_v24  ;;  %v1399_v57 = vsel %vm636_vm0, %v1383_v24, %v1270_v26  ;;  %v1386_v58 = vmul.f32 %v4583_v37, %v1256_v45  ;;  %v1691_v19 = vld [vmem:[%s4407_s28 + $0xb8] sm:$0xff]  ;;  %v1693_v22 = vld [vmem:[%s4407_s28 + $0x108] sm:$0xff]  ;;  %v1694_v24 = vld [vmem:[%s4407_s28 + $0x130] sm:$0xff] }
 0x385   : > { %v2871_v61 = vpop.f32.mrb[20].mxu0  ;;  %v1390_v30 = vsel %vm636_vm0, %v1269_v48, %v1382_v29  ;;  %v1398_v0 = vsel %vm636_vm0, %v1382_v29, %v1269_v48  ;;  %3212 = vmatprep.subr.bf16.mxu0 %v3211_v23  ;;  %3244 = vmatprep.subr.bf16.mxu1 %v3211_v23  ;;  %v3223_v37 = vpack.c.bf16 %v1712_v56, %v1711_v55  ;;  %v1985_v26 = vld [vmem:[#allocation19] sm:$0xff]  ;;  %v1988_v29 = vld [vmem:[#allocation19 + $0x18] sm:$0xff] }
 0x386   : > { %v1272_v35 = vmul.f32 %v2871_v61, %v1254_v20  ;;  %v1216_v3 = vpop.f32.mrb[21].mxu0  ;;  %2930 = vmatprep.mubr.msk.f32.mxu0 %vm1408_vm1, %v1390_v30  ;;  %2950 = vmatprep.mubr.msk.f32.mxu1 %vm1408_vm1, %v1398_v0  ;;  %v3231_v9 = vpack.c.bf16 %v1716_v8, %v1715_v7  ;;  %v1699_v20 = vld [vmem:[%s4407_s28 + $0xc0] sm:$0xff]  ;;  %v3271_v43 = vpack.c.bf16 %v1986_v27, %v1985_v26  ;;  %v2128_v30 = vld [vmem:[#allocation20 + $0x10] sm:$0xff] }
 0x387   : > { %v1271_v44 = vmul.f32 %v1252_v25, %v1216_v3  ;;  %2931 = vmatmul.mubr.msk.f32.gmra.mrb[26].mxu0 %vm1408_vm1, %v1391_v53  ;;  %2951 = vmatmul.mubr.msk.f32.gmra.mrb[18].mxu1 %vm1408_vm1, %v1399_v57  ;;  %v1702_v25 = vld [vmem:[%s4407_s28 + $0x138] sm:$0xff]  ;;  %v2126_v48 = vld [vmem:[#allocation20] sm:$0xff]  ;;  %v2127_v53 = vld [vmem:[#allocation20 + $0x8] sm:$0xff]  ;;  %v3275_v57 = vpack.c.bf16 %v1988_v29, %v1987_v28 }
 0x388   : > { %3214 = vmatpush3.bf16.msra.mxu0 %v3211_v23  ;;  %3246 = vmatpush3.bf16.msra.mxu1 %v3211_v23  ;;  %v1393_v33 = vsel %vm636_vm0, %v1272_v35, %v1385_v31  ;;  %v1401_v46 = vsel %vm636_vm0, %v1385_v31, %v1272_v35  ;;  %v1701_v23 = vld [vmem:[%s4407_s28 + $0x110] sm:$0xff]  ;;  %v4654_v61 = vpack.c.bf16 %v2127_v53, %v2126_v48  ;;  %v2129_v0 = vld [vmem:[#allocation20 + $0x18] sm:$0xff]  ;;  %s3833_s28 = scalar_lea.vmem %s3832_s15, 10240 }
 0x389   : > { %v2874_v47 = vpop.f32.mrb[22].mxu0  ;;  %v1392_v49 = vsel %vm636_vm0, %v1271_v44, %v1384_v41  ;;  %v1400_v50 = vsel %vm636_vm0, %v1384_v41, %v1271_v44  ;;  %3216 = vmatprep.subr.bf16.mxu0 %v3215_v32  ;;  %3248 = vmatprep.subr.bf16.mxu1 %v3215_v32  ;;  %p3835_p1 = scmp.lt.s32.totalorder %s3833_s28, %s3827_s19 }
 0x38a   : > { %v1274_v52 = vmul.f32 %v2874_v47, %v1258_v42  ;;  %v1226_v54 = vpop.f32.mrb[23].mxu0  ;;  %2933 = vmatprep.mubr.msk.f32.mxu0 %vm1408_vm1, %v1392_v49  ;;  %2953 = vmatprep.mubr.msk.f32.mxu1 %vm1408_vm1, %v1400_v50 }
 0x38b   : > { %v1273_v59 = vmul.f32 %v1256_v45, %v1226_v54  ;;  %2934 = vmatmul.mubr.msk.f32.gmra.mrb[28].mxu0 %vm1408_vm1, %v1393_v33  ;;  %2954 = vmatmul.mubr.msk.f32.gmra.mrb[20].mxu1 %vm1408_vm1, %v1401_v46  ;;  %v1827_v54 = vpop.permute.xlu1 %1826  ;;  %p3836_p13 = por %p3835_p1, %p3834_p12 }
 0x38c   : > { %3218 = vmatpush3.bf16.msra.mxu0 %v3215_v32  ;;  %3250 = vmatpush3.bf16.msra.mxu1 %v3215_v32  ;;  %v1395_v36 = vsel %vm636_vm0, %v1274_v52, %v1387_v51  ;;  %v1403_v60 = vsel %vm636_vm0, %v1387_v51, %v1274_v52  ;;  %v4659_v32 = vpack.c.bf16 %v2129_v0, %v2128_v30  ;;  %v1825_v52 = vpop.permute.xlu0 %1824 }
 0x38d   : > { %v1394_v62 = vsel %vm636_vm0, %v1273_v59, %v1386_v58  ;;  %v1402_v63 = vsel %vm636_vm0, %v1386_v58, %v1273_v59  ;;  %3220 = vmatprep.subr.bf16.mxu0 %v3219_v34  ;;  %3252 = vmatprep.subr.bf16.mxu1 %v3219_v34  ;;  %p3837_p0 = pnand %p3836_p13, %p3830_p3 }
 0x38e   : > { %2936 = vmatprep.mubr.msk.f32.mxu0 %vm1408_vm1, %v1394_v62  ;;  %2956 = vmatprep.mubr.msk.f32.mxu1 %vm1408_vm1, %v1402_v63 }
 0x38f   : > { %2937 = vmatmul.mubr.msk.f32.gmra.mrb[30].mxu0 %vm1408_vm1, %v1395_v36  ;;  %2957 = vmatmul.mubr.msk.f32.gmra.mrb[22].mxu1 %vm1408_vm1, %v1403_v60  ;;  %v1831_v56 = vpop.permute.xlu1 %1830 }
 0x390   : > { %3222 = vmatpush3.bf16.msra.mxu0 %v3219_v34  ;;  %3254 = vmatpush3.bf16.msra.mxu1 %v3219_v34  ;;  %v1829_v55 = vpop.permute.xlu0 %1828 }
 0x391   : > { %3224 = vmatprep.subr.bf16.mxu0 %v3223_v37  ;;  %3256 = vmatprep.subr.bf16.mxu1 %v3223_v37 }
 0x392   : > { %2991 = vmatprep.mubr.f32.mxu0 %v1687_v4  ;;  %3035 = vmatprep.mubr.f32.mxu1 %v1695_v5 }
 0x393   : > { %v1835_v4 = vpop.permute.xlu1 %1834 }
 0x394   : > { %3226 = vmatpush3.bf16.msra.mxu0 %v3223_v37  ;;  %3258 = vmatpush3.bf16.msra.mxu1 %v3223_v37  ;;  %v1833_v2 = vpop.permute.xlu0 %1832 }
 0x395   : > { %3228 = vmatprep.subr.bf16.mxu0 %v3227_v6  ;;  %3260 = vmatprep.subr.bf16.mxu1 %v3227_v6 }
 0x398   : > { %3230 = vmatpush3.bf16.msra.mxu0 %v3227_v6  ;;  %3262 = vmatpush3.bf16.msra.mxu1 %v3227_v6  ;;  %v1837_v28 = vpop.permute.xlu0 %1836 }
 0x399   : > { %3232 = vmatprep.subr.bf16.mxu0 %v3231_v9  ;;  %3264 = vmatprep.subr.bf16.mxu1 %v3231_v9 }
 0x39c   : > { %3234 = vmatpush3.bf16.msra.mxu0 %v3231_v9  ;;  %3266 = vmatpush3.bf16.msra.mxu1 %v3231_v9 }
 0x39d   : > { %3236 = vmatprep.subr.bf16.mxu0 %v3235_v12  ;;  %3268 = vmatprep.subr.bf16.mxu1 %v3235_v12 }
 0x3a0   : > { %3238 = vmatpush3.bf16.msra.mxu0 %v3235_v12  ;;  %3270 = vmatpush3.bf16.msra.mxu1 %v3235_v12 }
 0x3a1   : > { %3272 = vmatprep.subr.bf16.mxu0 %v3271_v43  ;;  %3287 = vmatprep.subr.bf16.mxu1 %v4654_v61 }
 0x3a3   : > { %2992 = vmatmul.mubr.f32.vlgmr.msra.gmra.mrb[32].mxu0 %v1688_v13  ;;  %3036 = vmatmul.mubr.f32.vlgmr.msra.gmra.mrb[24].mxu1 %v1696_v14 }
 0x3a4   : > { %2994 = vmatprep.mubr.f32.mxu0 %v1689_v15  ;;  %3038 = vmatprep.mubr.f32.mxu1 %v1697_v16 }
 0x3a5   : > { %3274 = vmatpush3.bf16.msra.mxu0 %v3271_v43  ;;  %3289 = vmatpush3.bf16.msra.mxu1 %v4654_v61  ;;  %v1839_v43 = vpop.permute.xlu1 %1838 }
 0x3a6   : > { %3276 = vmatprep.subr.bf16.mxu0 %v3275_v57  ;;  %3288 = vmatprep.subr.bf16.mxu1 %v4659_v32 }
 0x3a7   : > { %2995 = vmatmul.mubr.f32.gmra.mrb[34].mxu0 %v1690_v17  ;;  %3039 = vmatmul.mubr.f32.gmra.mrb[26].mxu1 %v1698_v18 }
 0x3a8   : > { %2997 = vmatprep.mubr.f32.mxu0 %v1691_v19  ;;  %3041 = vmatprep.mubr.f32.mxu1 %v1699_v20 }
 0x3a9   : > { %3278 = vmatpush3.bf16.msra.mxu0 %v3275_v57  ;;  %3290 = vmatpush3.bf16.msra.mxu1 %v4659_v32 }
 0x3aa   : > { %3280 = vmatprep.subr.bf16.mxu0 %v4654_v61 }
 0x3ab   : > { %2998 = vmatmul.mubr.f32.gmra.mrb[36].mxu0 %v1692_v21  ;;  %3042 = vmatmul.mubr.f32.gmra.mrb[28].mxu1 %v1700_v38 }
 0x3ac   : > { %3000 = vmatprep.mubr.f32.mxu0 %v1693_v22  ;;  %3044 = vmatprep.mubr.f32.mxu1 %v1701_v23 }
 0x3af   : > { %3001 = vmatmul.mubr.f32.gmra.mrb[38].mxu0 %v1694_v24  ;;  %3045 = vmatmul.mubr.f32.gmra.mrb[30].mxu1 %v1702_v25 }
 0x456   : > { %v2929_v31 = vpop.f32.mrb[24].mxu0  ;;  %v2949_v35 = vpop.f32.mrb[16].mxu1 }
 0x457   : > { %1539 = vst [vmem:[%s4588_s3 + $0x30] sm:$0xff] %v2929_v31  ;;  %1680 = vst [vmem:[%s4588_s3 + $0x38] sm:$0xff] %v2949_v35  ;;  %v1499_v3 = vpop.f32.mrb[25].mxu0  ;;  %v1640_v39 = vpop.f32.mrb[17].mxu1 }
 0x458   : > { %1538 = vst [vmem:[%s4588_s3 + $0x8] sm:$0xff] %v1499_v3  ;;  %1679 = vst [vmem:[%s4588_s3 + $0x10] sm:$0xff] %v1640_v39 }
 0x45a   : > { %v2932_v40 = vpop.f32.mrb[26].mxu0  ;;  %v2952_v41 = vpop.f32.mrb[18].mxu1 }
 0x45b   : > { %1541 = vst [vmem:[%s4588_s3 + $0x80] sm:$0xff] %v2932_v40  ;;  %1682 = vst [vmem:[%s4588_s3 + $0x88] sm:$0xff] %v2952_v41  ;;  %v1509_v42 = vpop.f32.mrb[27].mxu0  ;;  %v1650_v44 = vpop.f32.mrb[19].mxu1 }
 0x45c   : > { %1540 = vst [vmem:[%s4588_s3 + $0x58] sm:$0xff] %v1509_v42  ;;  %1681 = vst [vmem:[%s4588_s3 + $0x60] sm:$0xff] %v1650_v44 }
 0x45e   : > { %v2935_v45 = vpop.f32.mrb[28].mxu0  ;;  %v2955_v33 = vpop.f32.mrb[20].mxu1 }
 0x45f   : > { %1543 = vst [vmem:[%s4588_s3 + $0xd0] sm:$0xff] %v2935_v45  ;;  %1684 = vst [vmem:[%s4588_s3 + $0xd8] sm:$0xff] %v2955_v33  ;;  %v1519_v46 = vpop.f32.mrb[29].mxu0  ;;  %v1660_v47 = vpop.f32.mrb[21].mxu1 }
 0x460   : > { %1542 = vst [vmem:[%s4588_s3 + $0xa8] sm:$0xff] %v1519_v46  ;;  %1683 = vst [vmem:[%s4588_s3 + $0xb0] sm:$0xff] %v1660_v47 }
 0x462   : > { %v2938_v49 = vpop.f32.mrb[30].mxu0  ;;  %v2958_v50 = vpop.f32.mrb[22].mxu1 }
 0x463   : > { %1545 = vst [vmem:[%s4588_s3 + $0x120] sm:$0xff] %v2938_v49  ;;  %1686 = vst [vmem:[%s4588_s3 + $0x128] sm:$0xff] %v2958_v50  ;;  %v1529_v34 = vpop.f32.mrb[31].mxu0  ;;  %v1670_v51 = vpop.f32.mrb[23].mxu1 }
 0x464   : > { %1544 = vst [vmem:[%s4588_s3 + $0xf8] sm:$0xff] %v1529_v34  ;;  %1685 = vst [vmem:[%s4588_s3 + $0x100] sm:$0xff] %v1670_v51 }
 0x476   : > { %v2993_v58 = vpop.f32.mrb[32].mxu0  ;;  %v3037_v59 = vpop.f32.mrb[24].mxu1 }
 0x477   : > { %v1849_v36 = vmul.f32 %v2993_v58, %v1827_v54  ;;  %v1962_v60 = vmul.f32 %v3037_v59, %v1827_v54  ;;  %v1785_v62 = vpop.f32.mrb[33].mxu0  ;;  %v1922_v63 = vpop.f32.mrb[25].mxu1 }
 0x478   : > { %v1848_v37 = vmul.f32 %v1825_v52, %v1785_v62  ;;  %v1961_v1 = vmul.f32 %v1922_v63, %v1825_v52 }
 0x479   : > { %v1970_v5 = vsel %vm636_vm0, %v1849_v36, %v1962_v60  ;;  %v1978_v6 = vsel %vm636_vm0, %v1962_v60, %v1849_v36 }
 0x47a   : > { %v2996_v7 = vpop.f32.mrb[34].mxu0  ;;  %v3040_v8 = vpop.f32.mrb[26].mxu1  ;;  %v1969_v9 = vsel %vm636_vm0, %v1848_v37, %v1961_v1  ;;  %v1977_v10 = vsel %vm636_vm0, %v1961_v1, %v1848_v37 }
 0x47b   : > { %v1851_v11 = vmul.f32 %v2996_v7, %v1831_v56  ;;  %v1964_v12 = vmul.f32 %v3040_v8, %v1831_v56  ;;  %v1795_v13 = vpop.f32.mrb[35].mxu0  ;;  %v1932_v14 = vpop.f32.mrb[27].mxu1  ;;  %3055 = vmatprep.mubr.msk.f32.mxu0 %vm1408_vm1, %v1969_v9 }
 0x47c   : > { %v1850_v15 = vmul.f32 %v1829_v55, %v1795_v13  ;;  %v1963_v16 = vmul.f32 %v1932_v14, %v1829_v55  ;;  %3056 = vmatmul.mubr.msk.f32.vlgmr.msra.gmra.mrb[40].mxu0 %vm1408_vm1, %v1970_v5 }
 0x47d   : > { %v1980_v17 = vsel %vm636_vm0, %v1964_v12, %v1851_v11  ;;  %3282 = vmatpush3.bf16.msra.mxu0 %v4654_v61  ;;  %v1972_v18 = vsel %vm636_vm0, %v1851_v11, %v1964_v12 }
 0x47e   : > { %v2999_v19 = vpop.f32.mrb[36].mxu0  ;;  %v3043_v20 = vpop.f32.mrb[28].mxu1  ;;  %v1971_v21 = vsel %vm636_vm0, %v1850_v15, %v1963_v16  ;;  %v1979_v38 = vsel %vm636_vm0, %v1963_v16, %v1850_v15  ;;  %3284 = vmatprep.subr.bf16.mxu0 %v4659_v32 }
 0x47f   : > { %v1853_v22 = vmul.f32 %v2999_v19, %v1835_v4  ;;  %v1966_v23 = vmul.f32 %v3043_v20, %v1835_v4  ;;  %v1805_v24 = vpop.f32.mrb[37].mxu0  ;;  %v1942_v25 = vpop.f32.mrb[29].mxu1  ;;  %3058 = vmatprep.mubr.msk.f32.mxu0 %vm1408_vm1, %v1971_v21  ;;  %3078 = vmatprep.mubr.msk.f32.mxu1 %vm1408_vm1, %v1979_v38 }
 0x480   : > { %v1852_v26 = vmul.f32 %v1833_v2, %v1805_v24  ;;  %v1965_v27 = vmul.f32 %v1942_v25, %v1833_v2  ;;  %3059 = vmatmul.mubr.msk.f32.gmra.mrb[42].mxu0 %vm1408_vm1, %v1972_v18  ;;  %3079 = vmatmul.mubr.msk.f32.vlgmr.msra.gmra.mrb[32].mxu1 %vm1408_vm1, %v1980_v17 }
 0x481   : > { %v1974_v29 = vsel %vm636_vm0, %v1853_v22, %v1966_v23  ;;  %3286 = vmatpush3.bf16.msra.mxu0 %v4659_v32  ;;  %v1982_v48 = vsel %vm636_vm0, %v1966_v23, %v1853_v22 }
 0x482   : > { %v3002_v53 = vpop.f32.mrb[38].mxu0  ;;  %v3046_v57 = vpop.f32.mrb[30].mxu1  ;;  %v1973_v61 = vsel %vm636_vm0, %v1852_v26, %v1965_v27  ;;  %v1981_v30 = vsel %vm636_vm0, %v1965_v27, %v1852_v26 }
 0x483   : > { %v1855_v0 = vmul.f32 %v3002_v53, %v1839_v43  ;;  %v1968_v31 = vmul.f32 %v3046_v57, %v1839_v43  ;;  %v1815_v35 = vpop.f32.mrb[39].mxu0  ;;  %v1952_v3 = vpop.f32.mrb[31].mxu1  ;;  %3061 = vmatprep.mubr.msk.f32.mxu0 %vm1408_vm1, %v1973_v61  ;;  %3081 = vmatprep.mubr.msk.f32.mxu1 %vm1408_vm1, %v1981_v30 }
 0x484   : > { %v1854_v39 = vmul.f32 %v1837_v28, %v1815_v35  ;;  %v1967_v40 = vmul.f32 %v1952_v3, %v1837_v28  ;;  %3062 = vmatmul.mubr.msk.f32.gmra.mrb[44].mxu0 %vm1408_vm1, %v1974_v29  ;;  %3082 = vmatmul.mubr.msk.f32.gmra.mrb[34].mxu1 %vm1408_vm1, %v1982_v48 }
 0x485   : > { %v1976_v32 = vsel %vm636_vm0, %v1855_v0, %v1968_v31  ;;  %v1984_v41 = vsel %vm636_vm0, %v1968_v31, %v1855_v0 }
 0x486   : > { %v1975_v42 = vsel %vm636_vm0, %v1854_v39, %v1967_v40  ;;  %v1983_v44 = vsel %vm636_vm0, %v1967_v40, %v1854_v39 }
 0x487   : > { %3064 = vmatprep.mubr.msk.f32.mxu0 %vm1408_vm1, %v1975_v42  ;;  %3084 = vmatprep.mubr.msk.f32.mxu1 %vm1408_vm1, %v1983_v44 }
 0x488   : > { %3065 = vmatmul.mubr.msk.f32.gmra.mrb[46].mxu0 %vm1408_vm1, %v1976_v32  ;;  %3085 = vmatmul.mubr.msk.f32.gmra.mrb[36].mxu1 %vm1408_vm1, %v1984_v41 }
 0x489   : > { %3075 = vmatprep.mubr.msk.f32.mxu0 %vm1408_vm1, %v1977_v10 }
 0x48c   : > { %3076 = vmatmul.mubr.msk.f32.vlgmr.msra.gmra.mrb[48].mxu0 %vm1408_vm1, %v1978_v6 }
 0x54f   : > { %v3057_v45 = vpop.f32.mrb[40].mxu0 }
 0x550   : > { %2119 = vst [vmem:[%s4588_s3 + $0x40] sm:$0xff] %v3057_v45  ;;  %v2079_v33 = vpop.f32.mrb[41].mxu0 }
 0x551   : > { %2118 = vst [vmem:[%s4588_s3 + $0x18] sm:$0xff] %v2079_v33 }
 0x553   : > { %v3060_v46 = vpop.f32.mrb[42].mxu0  ;;  %v3080_v47 = vpop.f32.mrb[32].mxu1 }
 0x554   : > { %2121 = vst [vmem:[%s4588_s3 + $0x90] sm:$0xff] %v3060_v46  ;;  %2262 = vst [vmem:[%s4588_s3 + $0x98] sm:$0xff] %v3080_v47  ;;  %v2089_v49 = vpop.f32.mrb[43].mxu0  ;;  %v2230_v50 = vpop.f32.mrb[33].mxu1 }
 0x555   : > { %2120 = vst [vmem:[%s4588_s3 + $0x68] sm:$0xff] %v2089_v49  ;;  %2261 = vst [vmem:[%s4588_s3 + $0x70] sm:$0xff] %v2230_v50 }
 0x557   : > { %v3063_v34 = vpop.f32.mrb[44].mxu0  ;;  %v3083_v51 = vpop.f32.mrb[34].mxu1 }
 0x558   : > { %2123 = vst [vmem:[%s4588_s3 + $0xe0] sm:$0xff] %v3063_v34  ;;  %2264 = vst [vmem:[%s4588_s3 + $0xe8] sm:$0xff] %v3083_v51  ;;  %v2099_v52 = vpop.f32.mrb[45].mxu0  ;;  %v2240_v54 = vpop.f32.mrb[35].mxu1 }
 0x559   : > { %2122 = vst [vmem:[%s4588_s3 + $0xb8] sm:$0xff] %v2099_v52  ;;  %2263 = vst [vmem:[%s4588_s3 + $0xc0] sm:$0xff] %v2240_v54 }
 0x55b   : > { %v3066_v55 = vpop.f32.mrb[46].mxu0  ;;  %v3086_v56 = vpop.f32.mrb[36].mxu1 }
 0x55c   : > { %2125 = vst [vmem:[%s4588_s3 + $0x130] sm:$0xff] %v3066_v55  ;;  %2266 = vst [vmem:[%s4588_s3 + $0x138] sm:$0xff] %v3086_v56  ;;  %v2109_v58 = vpop.f32.mrb[47].mxu0  ;;  %v2250_v59 = vpop.f32.mrb[37].mxu1 }
 0x55d   : > { %2124 = vst [vmem:[%s4588_s3 + $0x108] sm:$0xff] %v2109_v58  ;;  %2265 = vst [vmem:[%s4588_s3 + $0x110] sm:$0xff] %v2250_v59 }
 0x55f   : > { %v3077_v36 = vpop.f32.mrb[48].mxu0 }
 0x560   : > { %2260 = vst [vmem:[%s4588_s3 + $0x48] sm:$0xff] %v3077_v36  ;;  %v2220_v60 = vpop.f32.mrb[49].mxu0 }
 0x561   : > { %2259 = vst [vmem:[%s4588_s3 + $0x20] sm:$0xff] %v2220_v60 }
 0x562   : > { %3840 = shalt.err (!%p3837_p0)
}
 0x563   : > { %s3841_s7 = scalar_lea.hbm %s4733_s0, 5120  ;;  %s3845_s13 = scalar_lea.hbm %s4848_s8, 20480 }
 0x564   : > { %p3842_p4 = scmp.ne.s32.totalorder %s4733_s0, %s3841_s7  ;;  %p3846_p10 = scmp.lt.u32.totalorder %s4733_s0, %s4848_s8 }
 0x565   : > { %p3847_p5 = scmp.lt.u32.totalorder %s3845_s13, %s3841_s7  ;;  %p3849_p8 = scmp.lt.u32.totalorder %s3841_s7, %s4733_s0 }
 0x566   : > { %p3843_p2 = pnand %p3842_p4, %p4849_p7 }
 0x567   : > { %p3848_p6 = por %p3847_p5, %p3846_p10 }
 0x568   : > { %p3844_p9 = pneg %p3843_p2 }
 0x569   : > { %p3850_p11 = por %p3849_p8, %p3848_p6 }
 0x56b   : > { %p3851_p3 = pnand %p3850_p11, %p3844_p9 }
 0x56d   : > { %3854 = shalt.err (!%p3851_p3)
}
 0x56e   : > { %s3942_s3 = smov 640   ;;  %s3943_s6 = smov 40  }
 0x56f   : > { %3339 = dma.vmem_to_hbm [thread:$0]  (%p4849_p7), %s4735_s17, 5120, %s4733_s0, %s2268_s27, %s3942_s3, %s3942_s3, %s3943_s6  }
 0x570 PF: > { %p3404_p12 = scmp.ge.s32.totalorder %s3921_s24, 2  ;;  %s2297_s5 = sand.u32 1, %s3909_s21  }
 0x571   : > { %p4850_p1 = scmp.ne.s32.totalorder %s4827_s26, 0  ;;  %s2298_s29 = scalar_lea.sflag [#allocation4], %s2297_s5 }
 0x573   : > { %p3380_p13 = pnand %p3404_p12, %p4850_p1 }
 0x575   : > { %3904 = dma.done.wait (!%p3380_p13), %s2298_s29, 5120  }
 0x576   : > { %3906 = vsyncadd (!%p3380_p13), %s2298_s29, 4294962176  ;;  %p33_p0 = scmp.ge.s32.totalorder %s4284_s25, 6   ;;  %s4851_s21 = smov %s3913_s22 }
 0x577   : > { %s4852_s22 = smov %s3917_s23  ;;  %s4853_s23 = smov %s4295_s1 }
 0x578   : > { %s4854_s24 = smov %s4284_s25  ;;  %35 = sbr.rel (!%p33_p0) target bundleno = 23 (0x17), region = 166 }
 0x57f   :  { %2303 = vsyncpa [#allocation3], 1 }
 0x580   :  { %2305 = vsyncpa [#allocation3 + $0x1], 1 }
 0x581   :  { %2306 = vsyncpa [#allocation6], 1 }
 0x582   :  { %2308 = vsyncpa [#allocation6 + $0x1], 1 }
 0x583   :  { %2309 = vsyncpa [#allocation9], 1 }
 0x584   :  { %2310 = vsyncpa [#allocation12], 1 }
 0x585   :  { %2311 = vsyncpa [#allocation15], 1 }
 0x586   :  { %2312 = vsyncpa [#allocation18], 1 }
 0x587   :  { %2313 = vsyncpa [#allocation21], 1 }
 0x588   :  { %2314 = vsyncpa [#allocation4], 1 }
 0x589   :  { %2316 = vsyncpa [#allocation4 + $0x1], 1 }

</bundles_post_ra>
